<compile_context>
chip_gen: v7x
topology: tpu7x:2x2x1
jax: 0.10.0
libtpu: 0.0.40
codegen_flags: <defaults>
</compile_context>

<pallas_src>
import math
from functools import partial

import jax
import jax.numpy as jnp
from jax.experimental import pallas as pl
from jax.experimental.pallas import tpu as pltpu


# ----------------------------- kernel helpers ------------------------------ #

def _layernorm(x, g, b, eps=1e-6):
    # Annotated-transformer LayerNorm: a2 * (x - mean) / (std + eps) + b2
    # with torch's unbiased std (ddof = 1).  All math in f32.  Exact
    # reciprocal here (error would compound across 3N+1 norms otherwise).
    d = x.shape[-1]
    mean = jnp.mean(x, axis=-1, keepdims=True)
    xc = x - mean
    var = jnp.sum(xc * xc, axis=-1, keepdims=True) * (1.0 / (d - 1))
    inv = 1.0 / (jnp.sqrt(var) + eps)          # (T, 1) exact reciprocal
    return g * (xc * inv) + b


def _attn_core(q, k, v, wo, bo, bias, num_heads):
    # q: (T, D) f32 (already scaled by 1/sqrt(dk) via packed Q weights)
    # k, v: (S, D) f32 or bf16;  wo: (D, D) bf16;  bo: (1, D) f32
    # bias: (T, S) bf16 additive mask (0 kept / -1e9 masked), or None.
    T, D = q.shape
    dk = D // num_heads
    q16 = q.astype(jnp.bfloat16)
    k16 = k.astype(jnp.bfloat16)
    v16 = v.astype(jnp.bfloat16)
    ctx = []
    # Static unroll: H is small here.  TODO(synk): lax.fori_loop for large H.
    for h in range(num_heads):
        lo = h * dk
        qh = q16[:, lo:lo + dk]                          # (T, dk)
        kh = k16[:, lo:lo + dk]                          # (S, dk)
        vh = v16[:, lo:lo + dk]                          # (S, dk)
        # Contract last dims directly - no explicit per-head K transpose.
        s = jax.lax.dot_general(qh, kh, (((1,), (1,)), ((), ())),
                                preferred_element_type=jnp.float32)   # (T, S)
        if bias is not None:
            s = s + bias
        m = jnp.max(s, axis=-1, keepdims=True)
        e = jnp.exp(s - m)
        p = e * pl.reciprocal(jnp.sum(e, axis=-1, keepdims=True), approx=True)
        ctx.append(jnp.dot(p.astype(jnp.bfloat16), vh,
                           preferred_element_type=jnp.float32))       # (T, dk)
    # Single full-depth (K = D) output projection on the concatenated heads.
    ctx = jnp.concatenate(ctx, axis=-1).astype(jnp.bfloat16)          # (T, D)
    return jnp.dot(ctx, wo, preferred_element_type=jnp.float32) + bo


# --------------------------------- kernel ---------------------------------- #

def _decoder_kernel(x_ref, mem_ref, tbias_ref, sbias_ref,
                    lng_ref, lnb_ref,
                    sa_wqkv_ref, sa_bqkv_ref, sa_wo_ref, sa_bo_ref,
                    ca_wq_ref, ca_bq_ref, ca_wkv_ref, ca_bkv_ref,
                    ca_wo_ref, ca_bo_ref,
                    w1_ref, b1_ref, w2_ref, b2_ref,
                    fng_ref, fnb_ref,
                    out_ref, x_carry,
                    *, num_heads, num_layers, dff_chunk, skip_src_bias):
    li = pl.program_id(1)                 # layer index (grid = (batch, layer))

    @pl.when(li == 0)
    def _():                              # start of a new batch element
        x_carry[...] = x_ref[...]

    x = x_carry[0]                        # (T, D) f32 residual stream
    mem = mem_ref[0]                      # (S, D) bf16 encoder memory
    tbias = tbias_ref[...]                # (T, T) bf16 additive self-attn bias
    sbias = None if skip_src_bias else sbias_ref[...]    # (T, S) or skipped
    D = x.shape[-1]

    # ---- Sublayer 0: masked self-attention (dropout = identity at inference).
    xn = _layernorm(x, lng_ref[0, 0], lnb_ref[0, 0])
    qkv = jnp.dot(xn.astype(jnp.bfloat16), sa_wqkv_ref[0],
                  preferred_element_type=jnp.float32) + sa_bqkv_ref[0]
    x = x + _attn_core(qkv[:, :D], qkv[:, D:2 * D], qkv[:, 2 * D:],
                       sa_wo_ref[0], sa_bo_ref[0], tbias, num_heads)

    # ---- Sublayer 1: cross-attention over encoder memory.
    xn = _layernorm(x, lng_ref[0, 1], lnb_ref[0, 1])
    q = jnp.dot(xn.astype(jnp.bfloat16), ca_wq_ref[0],
                preferred_element_type=jnp.float32) + ca_bq_ref[0]
    kv = jnp.dot(mem, ca_wkv_ref[0],
                 preferred_element_type=jnp.float32) + ca_bkv_ref[0]
    x = x + _attn_core(q, kv[:, :D], kv[:, D:],
                       ca_wo_ref[0], ca_bo_ref[0], sbias, num_heads)

    # ---- Sublayer 2: feed forward (Linear -> ReLU -> Linear), tiled over DFF
    # so the (T, DFF_chunk) f32 intermediate stays bounded at realistic DFF.
    xn16 = _layernorm(x, lng_ref[0, 2], lnb_ref[0, 2]).astype(jnp.bfloat16)
    dff = w1_ref.shape[-1]
    ffn = jnp.zeros_like(x)
    for c in range(dff // dff_chunk):     # static loop; 1 iteration at toy DFF
        lo = c * dff_chunk
        h1 = jnp.maximum(
            jnp.dot(xn16, w1_ref[0, :, lo:lo + dff_chunk],
                    preferred_element_type=jnp.float32)
            + b1_ref[0, :, lo:lo + dff_chunk], 0.0)
        ffn = ffn + jnp.dot(h1.astype(jnp.bfloat16),
                            w2_ref[0, lo:lo + dff_chunk, :],
                            preferred_element_type=jnp.float32)
    x = x + ffn + b2_ref[0]

    x_carry[0] = x                        # carry residual to the next layer

    @pl.when(li == num_layers - 1)        # fuse Decoder.norm into last layer
    def _():
        out_ref[0] = _layernorm(x, fng_ref[0], fnb_ref[0]).astype(out_ref.dtype)

    @pl.when(li != num_layers - 1)
    def _():
        out_ref[0] = x.astype(out_ref.dtype)


# --------------------------------- wrapper ---------------------------------- #

def _pick_vmem_limit():
    # ~85% of physical VMEM: ~108 MiB on v5e/v6e (128 MiB), ~54 MiB on v7x (64).
    try:
        cap = int(pltpu.get_tpu_info().vmem_capacity_bytes)
        return max(32 << 20, min(int(cap * 0.85), cap - (8 << 20)))
    except Exception:
        return None                      # compiler default scoped limit


def decoder_forward(x, memory, src_mask, tgt_mask, stacked, fin_g, fin_b,
                    *, num_heads):
    """N-layer Decoder forward: all layers + final LayerNorm in ONE kernel."""
    B, T, D = x.shape
    S = memory.shape[1]
    L = stacked["w1"].shape[0]
    DFF = stacked["w1"].shape[-1]
    H = num_heads

    # Additive mask biases, bf16 (halves mask DMA / VMEM vs f32).
    tbias = jnp.where(tgt_mask == 0, -1e9, 0.0).astype(jnp.bfloat16)
    sbias = jnp.where(src_mask == 0, -1e9, 0.0).astype(jnp.bfloat16)
    # Static host-side check: skip the trivially-zero src-bias add entirely.
    try:
        skip_src_bias = bool(jnp.all(src_mask != 0))
    except Exception:                    # traced/abstract mask: keep the add
        skip_src_bias = False

    mem_b16 = memory.astype(jnp.bfloat16)   # memory only feeds K/V matmuls

    # DFF chunk: largest "nice" divisor of DFF that is <= 512.
    dff_chunk = math.gcd(DFF, 512)
    if dff_chunk < min(DFF, 128):
        dff_chunk = DFF

    kernel = partial(_decoder_kernel, num_heads=H, num_layers=L,
                     dff_chunk=dff_chunk, skip_src_bias=skip_src_bias)

    xmap = lambda b, l: (b, 0, 0)        # per-batch activations
    wmap = lambda b, l: (l, 0, 0)        # per-layer stacked weights
    cmap = lambda b, l: (0, 0)           # constants (masks, final LN)

    # Rough roofline numbers so XLA can schedule surrounding HBM traffic.
    flops_per = (2 * T * D * 3 * D + 4 * T * T * D + 2 * T * D * D   # self
                 + 2 * T * D * D + 4 * S * D * D + 4 * T * S * D
                 + 2 * T * D * D                                     # cross
                 + 4 * T * D * DFF)                                  # ffn
    trans_per = H * T * (T + S) + 2 * H * T + 3 * T
    w_bytes = (8 * D * D + 2 * D * DFF) * 2                          # bf16
    cost = pl.CostEstimate(
        flops=int(B * L * flops_per),
        transcendentals=int(B * L * trans_per + B * T),
        bytes_accessed=int(B * L * w_bytes + B * (2 * T * D + S * D) * 4
                           + 2 * (T * T + T * S)))

    return pl.pallas_call(
        kernel,
        out_shape=jax.ShapeDtypeStruct((B, T, D), x.dtype),
        grid=(B, L),
        in_specs=[
            pl.BlockSpec((1, T, D), xmap),          # x (f32)
            pl.BlockSpec((1, S, D), xmap),          # memory (bf16)
            pl.BlockSpec((T, T), cmap),             # tgt additive bias (bf16)
            pl.BlockSpec((T, S), cmap),             # src additive bias (bf16)
            pl.BlockSpec((1, 3, D), wmap),          # LN gammas
            pl.BlockSpec((1, 3, D), wmap),          # LN betas
            pl.BlockSpec((1, D, 3 * D), wmap),      # self-attn fused Wqkv (bf16)
            pl.BlockSpec((1, 1, 3 * D), wmap),      # self-attn fused bias
            pl.BlockSpec((1, D, D), wmap),          # self-attn Wo (bf16)
            pl.BlockSpec((1, 1, D), wmap),          # self-attn bo
            pl.BlockSpec((1, D, D), wmap),          # cross-attn Wq (bf16)
            pl.BlockSpec((1, 1, D), wmap),          # cross-attn bq
            pl.BlockSpec((1, D, 2 * D), wmap),      # cross-attn fused Wkv (bf16)
            pl.BlockSpec((1, 1, 2 * D), wmap),      # cross-attn fused bkv
            pl.BlockSpec((1, D, D), wmap),          # cross-attn Wo (bf16)
            pl.BlockSpec((1, 1, D), wmap),          # cross-attn bo
            pl.BlockSpec((1, D, DFF), wmap),        # FFN W1 (bf16)
            pl.BlockSpec((1, 1, DFF), wmap),        # FFN b1
            pl.BlockSpec((1, DFF, D), wmap),        # FFN W2 (bf16)
            pl.BlockSpec((1, 1, D), wmap),          # FFN b2
            pl.BlockSpec((1, D), cmap),             # final LN gamma
            pl.BlockSpec((1, D), cmap),             # final LN beta
        ],
        out_specs=pl.BlockSpec((1, T, D), xmap),
        scratch_shapes=[pltpu.VMEM((1, T, D), jnp.float32)],   # residual carry
        compiler_params=pltpu.CompilerParams(
            dimension_semantics=("parallel", "arbitrary"),
            vmem_limit_bytes=_pick_vmem_limit()),
        cost_estimate=cost,
    )(x, mem_b16, tbias, sbias,
      stacked["ln_g"], stacked["ln_b"],
      stacked["sa_wqkv"], stacked["sa_bqkv"], stacked["sa_wo"], stacked["sa_bo"],
      stacked["ca_wq"], stacked["ca_bq"], stacked["ca_wkv"], stacked["ca_bkv"],
      stacked["ca_wo"], stacked["ca_bo"],
      stacked["w1"], stacked["b1"], stacked["w2"], stacked["b2"],
      fin_g, fin_b)


# --------------------------- parameter packing ------------------------------ #

def pack_layer_params(p, num_heads):
    D = p["sa_wq"].shape[0]
    dk = D // num_heads
    inv = 1.0 / math.sqrt(dk)                  # fold softmax scale into Q proj
    bf, f32 = jnp.bfloat16, jnp.float32
    return {
        "sa_wqkv": jnp.concatenate(
            [p["sa_wq"] * inv, p["sa_wk"], p["sa_wv"]], axis=1).astype(bf),
        "sa_bqkv": jnp.concatenate(
            [p["sa_bq"] * inv, p["sa_bk"], p["sa_bv"]])[None, :].astype(f32),
        "sa_wo": p["sa_wo"].astype(bf),
        "sa_bo": p["sa_bo"][None, :].astype(f32),
        "ca_wq": (p["ca_wq"] * inv).astype(bf),
        "ca_bq": (p["ca_bq"] * inv)[None, :].astype(f32),
        "ca_wkv": jnp.concatenate([p["ca_wk"], p["ca_wv"]], axis=1).astype(bf),
        "ca_bkv": jnp.concatenate([p["ca_bk"], p["ca_bv"]])[None, :].astype(f32),
        "ca_wo": p["ca_wo"].astype(bf),
        "ca_bo": p["ca_bo"][None, :].astype(f32),
        "w1": p["w1"].astype(bf), "b1": p["b1"][None, :].astype(f32),
        "w2": p["w2"].astype(bf), "b2": p["b2"][None, :].astype(f32),
        "ln_g": p["ln_g"].astype(f32), "ln_b": p["ln_b"].astype(f32),
    }


def pack_decoder_params(raw_layers, num_heads):
    """Pack each layer, then stack every tensor along a leading layer axis."""
    per_layer = [pack_layer_params(p, num_heads) for p in raw_layers]
    return {k: jnp.stack([lp[k] for lp in per_layer], axis=0)
            for k in per_layer[0]}


# ------------------------- pure-JAX reference check ------------------------ #

def _ref_layernorm(x, g, b, eps=1e-6):
    mean = jnp.mean(x, axis=-1, keepdims=True)
    xc = x - mean
    var = jnp.sum(xc * xc, axis=-1, keepdims=True) / (x.shape[-1] - 1)
    return g * xc / (jnp.sqrt(var) + eps) + b


def _ref_mha(q_in, kv_in, wq, wk, wv, wo, bq, bk, bv, bo, mask, num_heads):
    d = q_in.shape[-1]
    dk = d // num_heads
    scale = 1.0 / math.sqrt(dk)
    q = q_in @ wq + bq
    k = kv_in @ wk + bk
    v = kv_in @ wv + bv
    heads = []
    for h in range(num_heads):
        qh = q[:, h * dk:(h + 1) * dk]
        kh = k[:, h * dk:(h + 1) * dk]
        vh = v[:, h * dk:(h + 1) * dk]
        s = (qh @ kh.T) * scale
        s = jnp.where(mask == 0, -1e9, s)
        p = jax.nn.softmax(s, axis=-1)
        heads.append(p @ vh)
    return jnp.concatenate(heads, axis=-1) @ wo + bo


def decoder_ref(x, memory, src_mask, tgt_mask, raw_layers, fin_g, fin_b, num_heads):
    outs = []
    for bi in range(x.shape[0]):
        xb, mb = x[bi], memory[bi]
        for p in raw_layers:
            xn = _ref_layernorm(xb, p["ln_g"][0], p["ln_b"][0])
            xb = xb + _ref_mha(xn, xn, p["sa_wq"], p["sa_wk"], p["sa_wv"], p["sa_wo"],
                               p["sa_bq"], p["sa_bk"], p["sa_bv"], p["sa_bo"],
                               tgt_mask, num_heads)
            xn = _ref_layernorm(xb, p["ln_g"][1], p["ln_b"][1])
            xb = xb + _ref_mha(xn, mb, p["ca_wq"], p["ca_wk"], p["ca_wv"], p["ca_wo"],
                               p["ca_bq"], p["ca_bk"], p["ca_bv"], p["ca_bo"],
                               src_mask, num_heads)
            xn = _ref_layernorm(xb, p["ln_g"][2], p["ln_b"][2])
            h1 = jnp.maximum(xn @ p["w1"] + p["b1"], 0.0)
            xb = xb + h1 @ p["w2"] + p["b2"]
        outs.append(_ref_layernorm(xb, fin_g, fin_b))
    return jnp.stack(outs, axis=0)


# ----------------------------------- main ----------------------------------- #

def init_layer_params(key, D, DFF):
    ks = jax.random.split(key, 22)
    n = lambda k, shape, s: s * jax.random.normal(k, shape, dtype=jnp.float32)
    return {
        "sa_wq": n(ks[0], (D, D), 0.05), "sa_wk": n(ks[1], (D, D), 0.05),
        "sa_wv": n(ks[2], (D, D), 0.05), "sa_wo": n(ks[3], (D, D), 0.05),
        "sa_bq": n(ks[4], (D,), 0.01), "sa_bk": n(ks[5], (D,), 0.01),
        "sa_bv": n(ks[6], (D,), 0.01), "sa_bo": n(ks[7], (D,), 0.01),
        "ca_wq": n(ks[8], (D, D), 0.05), "ca_wk": n(ks[9], (D, D), 0.05),
        "ca_wv": n(ks[10], (D, D), 0.05), "ca_wo": n(ks[11], (D, D), 0.05),
        "ca_bq": n(ks[12], (D,), 0.01), "ca_bk": n(ks[13], (D,), 0.01),
        "ca_bv": n(ks[14], (D,), 0.01), "ca_bo": n(ks[15], (D,), 0.01),
        "w1": n(ks[16], (D, DFF), 0.05), "b1": n(ks[17], (DFF,), 0.01),
        "w2": n(ks[18], (DFF, D), 0.05), "b2": n(ks[19], (D,), 0.01),
        "ln_g": 1.0 + n(ks[20], (3, D), 0.1),
        "ln_b": n(ks[21], (3, D), 0.1),
    }


if __name__ == "__main__":
    B, T, S, D, H, DFF, N = 2, 8, 16, 32, 4, 64, 2

    key = jax.random.PRNGKey(0)
    k_x, k_m, k_fin, *k_layers = jax.random.split(key, 3 + N)

    x = jax.random.normal(k_x, (B, T, D), dtype=jnp.float32)
    memory = jax.random.normal(k_m, (B, S, D), dtype=jnp.float32)

    # Masks: causal for self-attention, all-ones for source attention.
    tgt_mask = jnp.tril(jnp.ones((T, T), dtype=jnp.float32))
    src_mask = jnp.ones((T, S), dtype=jnp.float32)

    raw_layers = [init_layer_params(k, D, DFF) for k in k_layers]
    kf1, kf2 = jax.random.split(k_fin)
    fin_g = 1.0 + 0.1 * jax.random.normal(kf1, (D,), dtype=jnp.float32)
    fin_b = 0.1 * jax.random.normal(kf2, (D,), dtype=jnp.float32)

    stacked = pack_decoder_params(raw_layers, H)

    out = decoder_forward(x, memory, src_mask, tgt_mask, stacked,
                          fin_g[None, :], fin_b[None, :], num_heads=H)
    out = jax.block_until_ready(out)

    ref = decoder_ref(x, memory, src_mask, tgt_mask, raw_layers, fin_g, fin_b, H)
    assert out.shape == (B, T, D)
    max_err = float(jnp.max(jnp.abs(out - ref)))
    # bf16 MXU operands + approx softmax reciprocal => bf16-class tolerance.
    assert jnp.allclose(out, ref, atol=3e-2, rtol=3e-2), \
        f"mismatch vs JAX reference (max abs err {max_err})"

    print("KERNEL_OK")
</pallas_src>

<mosaic_0001>
module attributes {stable_mosaic.version = 11 : i64} {
  func.func @_decoder_kernel(%arg0: i32, %arg1: i32, %arg2: memref<1x8x32xf32, #tpu.memory_space<vmem>>, %arg3: memref<1x16x32xbf16, #tpu.memory_space<vmem>>, %arg4: memref<8x8xbf16, #tpu.memory_space<vmem>>, %arg5: memref<8x16xbf16, #tpu.memory_space<vmem>>, %arg6: memref<1x3x32xf32, #tpu.memory_space<vmem>>, %arg7: memref<1x3x32xf32, #tpu.memory_space<vmem>>, %arg8: memref<1x32x96xbf16, #tpu.memory_space<vmem>>, %arg9: memref<1x1x96xf32, #tpu.memory_space<vmem>>, %arg10: memref<1x32x32xbf16, #tpu.memory_space<vmem>>, %arg11: memref<1x1x32xf32, #tpu.memory_space<vmem>>, %arg12: memref<1x32x32xbf16, #tpu.memory_space<vmem>>, %arg13: memref<1x1x32xf32, #tpu.memory_space<vmem>>, %arg14: memref<1x32x64xbf16, #tpu.memory_space<vmem>>, %arg15: memref<1x1x64xf32, #tpu.memory_space<vmem>>, %arg16: memref<1x32x32xbf16, #tpu.memory_space<vmem>>, %arg17: memref<1x1x32xf32, #tpu.memory_space<vmem>>, %arg18: memref<1x32x64xbf16, #tpu.memory_space<vmem>>, %arg19: memref<1x1x64xf32, #tpu.memory_space<vmem>>, %arg20: memref<1x64x32xbf16, #tpu.memory_space<vmem>>, %arg21: memref<1x1x32xf32, #tpu.memory_space<vmem>>, %arg22: memref<1x32xf32, #tpu.memory_space<vmem>>, %arg23: memref<1x32xf32, #tpu.memory_space<vmem>>, %arg24: memref<1x8x32xf32, #tpu.memory_space<vmem>>, %arg25: memref<1x8x32xf32, #tpu.memory_space<vmem>>) attributes {dimension_semantics = [#tpu.dimension_semantics<parallel>, #tpu.dimension_semantics<arbitrary>], iteration_bounds = array<i64: 2, 2>, scalar_prefetch = 0 : i64, scratch_operands = 1 : i64, tpu.core_type = #tpu.core_type<tc>, window_params = [{transform_indices = @transform_0, window_bounds = array<i64: 1, 8, 32>}, {transform_indices = @transform_1, window_bounds = array<i64: 1, 16, 32>}, {pipeline_mode = #tpu.pipeline_mode<synchronous>, transform_indices = @transform_2, window_bounds = array<i64: 8, 8>}, {pipeline_mode = #tpu.pipeline_mode<synchronous>, transform_indices = @transform_3, window_bounds = array<i64: 8, 16>}, {transform_indices = @transform_4, window_bounds = array<i64: 1, 3, 32>}, {transform_indices = @transform_5, window_bounds = array<i64: 1, 3, 32>}, {transform_indices = @transform_6, window_bounds = array<i64: 1, 32, 96>}, {transform_indices = @transform_7, window_bounds = array<i64: 1, 1, 96>}, {transform_indices = @transform_8, window_bounds = array<i64: 1, 32, 32>}, {transform_indices = @transform_9, window_bounds = array<i64: 1, 1, 32>}, {transform_indices = @transform_10, window_bounds = array<i64: 1, 32, 32>}, {transform_indices = @transform_11, window_bounds = array<i64: 1, 1, 32>}, {transform_indices = @transform_12, window_bounds = array<i64: 1, 32, 64>}, {transform_indices = @transform_13, window_bounds = array<i64: 1, 1, 64>}, {transform_indices = @transform_14, window_bounds = array<i64: 1, 32, 32>}, {transform_indices = @transform_15, window_bounds = array<i64: 1, 1, 32>}, {transform_indices = @transform_16, window_bounds = array<i64: 1, 32, 64>}, {transform_indices = @transform_17, window_bounds = array<i64: 1, 1, 64>}, {transform_indices = @transform_18, window_bounds = array<i64: 1, 64, 32>}, {transform_indices = @transform_19, window_bounds = array<i64: 1, 1, 32>}, {pipeline_mode = #tpu.pipeline_mode<synchronous>, transform_indices = @transform_20, window_bounds = array<i64: 1, 32>}, {pipeline_mode = #tpu.pipeline_mode<synchronous>, transform_indices = @transform_21, window_bounds = array<i64: 1, 32>}, {transform_indices = @transform_22, window_bounds = array<i64: 1, 8, 32>}]} {
    %c0_i32 = arith.constant 0 : i32
    %0 = arith.cmpi eq, %arg1, %c0_i32 : i32
    %1 = arith.extui %0 : i1 to i32
    %c0_i32_0 = arith.constant 0 : i32
    %2 = arith.cmpi ne, %1, %c0_i32_0 : i32
    scf.if %2 {
      %c0_130 = arith.constant 0 : index
      %c0_131 = arith.constant 0 : index
      %c0_132 = arith.constant 0 : index
      %312 = vector.load %arg2[%c0_130, %c0_131, %c0_132] : memref<1x8x32xf32, #tpu.memory_space<vmem>>, vector<1x8x32xf32>
      %c0_133 = arith.constant 0 : index
      %c0_134 = arith.constant 0 : index
      %c0_135 = arith.constant 0 : index
      %313 = vector.load %arg25[%c0_133, %c0_134, %c0_135] : memref<1x8x32xf32, #tpu.memory_space<vmem>>, vector<1x8x32xf32>
      tpu.vector_store %arg25[%c0_133, %c0_134, %c0_135], %312 {strides = array<i32>} : memref<1x8x32xf32, #tpu.memory_space<vmem>>, vector<1x8x32xf32>,
    } else {
    }
    %c0 = arith.constant 0 : index
    %c0_1 = arith.constant 0 : index
    %c0_2 = arith.constant 0 : index
    %3 = vector.load %arg25[%c0, %c0_1, %c0_2] : memref<1x8x32xf32, #tpu.memory_space<vmem>>, vector<1x8x32xf32>
    %4 = vector.shape_cast %3 : vector<1x8x32xf32> to vector<8x32xf32>
    %c0_3 = arith.constant 0 : index
    %c0_4 = arith.constant 0 : index
    %c0_5 = arith.constant 0 : index
    %5 = vector.load %arg3[%c0_3, %c0_4, %c0_5] : memref<1x16x32xbf16, #tpu.memory_space<vmem>>, vector<1x16x32xbf16>
    %6 = vector.shape_cast %5 : vector<1x16x32xbf16> to vector<16x32xbf16>
    %c0_6 = arith.constant 0 : index
    %c0_7 = arith.constant 0 : index
    %7 = vector.load %arg4[%c0_6, %c0_7] : memref<8x8xbf16, #tpu.memory_space<vmem>>, vector<8x8xbf16>
    %c0_8 = arith.constant 0 : index
    %c0_9 = arith.constant 0 : index
    %c0_10 = arith.constant 0 : index
    %8 = vector.load %arg6[%c0_8, %c0_9, %c0_10] : memref<1x3x32xf32, #tpu.memory_space<vmem>>, vector<1x1x32xf32>
    %9 = vector.shape_cast %8 : vector<1x1x32xf32> to vector<32xf32>
    %c0_11 = arith.constant 0 : index
    %c0_12 = arith.constant 0 : index
    %c0_13 = arith.constant 0 : index
    %10 = vector.load %arg7[%c0_11, %c0_12, %c0_13] : memref<1x3x32xf32, #tpu.memory_space<vmem>>, vector<1x1x32xf32>
    %11 = vector.shape_cast %10 : vector<1x1x32xf32> to vector<32xf32>
    %cst = arith.constant dense<0.000000e+00> : vector<8xf32>
    %12 = vector.multi_reduction <add>, %4, %cst [1] : vector<8x32xf32> to vector<8xf32>
    %13 = vector.shape_cast %12 : vector<8xf32> to vector<8x1xf32>
    %cst_14 = arith.constant 3.200000e+01 : f32
    %14 = vector.broadcast %cst_14 : f32 to vector<8x1xf32>
    %15 = arith.divf %13, %14 : vector<8x1xf32>
    %16 = vector.broadcast %15 : vector<8x1xf32> to vector<8x32xf32>
    %17 = arith.subf %4, %16 : vector<8x32xf32>
    %18 = arith.mulf %17, %17 : vector<8x32xf32>
    %cst_15 = arith.constant dense<0.000000e+00> : vector<8xf32>
    %19 = vector.multi_reduction <add>, %18, %cst_15 [1] : vector<8x32xf32> to vector<8xf32>
    %20 = vector.shape_cast %19 : vector<8xf32> to vector<8x1xf32>
    %cst_16 = arith.constant 0.0322580636 : f32
    %21 = vector.broadcast %cst_16 : f32 to vector<8x1xf32>
    %22 = arith.mulf %20, %21 : vector<8x1xf32>
    %23 = math.sqrt %22 : vector<8x1xf32>
    %cst_17 = arith.constant 9.99999997E-7 : f32
    %24 = vector.broadcast %cst_17 : f32 to vector<8x1xf32>
    %25 = arith.addf %23, %24 : vector<8x1xf32>
    %cst_18 = arith.constant 1.000000e+00 : f32
    %26 = vector.broadcast %cst_18 : f32 to vector<8x1xf32>
    %27 = arith.divf %26, %25 : vector<8x1xf32>
    %28 = vector.broadcast %27 : vector<8x1xf32> to vector<8x32xf32>
    %29 = arith.mulf %17, %28 : vector<8x32xf32>
    %30 = vector.shape_cast %9 : vector<32xf32> to vector<1x32xf32>
    %31 = vector.broadcast %30 : vector<1x32xf32> to vector<8x32xf32>
    %32 = arith.mulf %31, %29 : vector<8x32xf32>
    %33 = vector.shape_cast %11 : vector<32xf32> to vector<1x32xf32>
    %34 = vector.broadcast %33 : vector<1x32xf32> to vector<8x32xf32>
    %35 = arith.addf %32, %34 : vector<8x32xf32>
    %36 = arith.truncf %35 : vector<8x32xf32> to vector<8x32xbf16>
    %c0_19 = arith.constant 0 : index
    %c0_20 = arith.constant 0 : index
    %c0_21 = arith.constant 0 : index
    %37 = vector.load %arg8[%c0_19, %c0_20, %c0_21] : memref<1x32x96xbf16, #tpu.memory_space<vmem>>, vector<1x32x96xbf16>
    %38 = vector.shape_cast %37 : vector<1x32x96xbf16> to vector<32x96xbf16>
    %cst_22 = arith.constant dense<0.000000e+00> : vector<8x96xf32>
    %39 = tpu.matmul %36, %38, %cst_22 {dimension_numbers = #tpu.dot_dimension_numbers<[1], [0], [0], [1], [0, 0, 1, 1], [], []>} : vector<8x32xbf16>, vector<32x96xbf16>, vector<8x96xf32> -> vector<8x96xf32>
    %c0_23 = arith.constant 0 : index
    %c0_24 = arith.constant 0 : index
    %c0_25 = arith.constant 0 : index
    %40 = vector.load %arg9[%c0_23, %c0_24, %c0_25] : memref<1x1x96xf32, #tpu.memory_space<vmem>>, vector<1x1x96xf32>
    %41 = vector.shape_cast %40 : vector<1x1x96xf32> to vector<1x96xf32>
    %42 = vector.broadcast %41 : vector<1x96xf32> to vector<8x96xf32>
    %43 = arith.addf %39, %42 : vector<8x96xf32>
    %44 = vector.extract_strided_slice %43 {offsets = [0, 0], sizes = [8, 32], strides = [1, 1]} : vector<8x96xf32> to vector<8x32xf32>
    %45 = vector.extract_strided_slice %43 {offsets = [0, 32], sizes = [8, 32], strides = [1, 1]} : vector<8x96xf32> to vector<8x32xf32>
    %46 = vector.extract_strided_slice %43 {offsets = [0, 64], sizes = [8, 32], strides = [1, 1]} : vector<8x96xf32> to vector<8x32xf32>
    %c0_26 = arith.constant 0 : index
    %c0_27 = arith.constant 0 : index
    %c0_28 = arith.constant 0 : index
    %47 = vector.load %arg10[%c0_26, %c0_27, %c0_28] : memref<1x32x32xbf16, #tpu.memory_space<vmem>>, vector<1x32x32xbf16>
    %48 = vector.shape_cast %47 : vector<1x32x32xbf16> to vector<32x32xbf16>
    %c0_29 = arith.constant 0 : index
    %c0_30 = arith.constant 0 : index
    %c0_31 = arith.constant 0 : index
    %49 = vector.load %arg11[%c0_29, %c0_30, %c0_31] : memref<1x1x32xf32, #tpu.memory_space<vmem>>, vector<1x1x32xf32>
    %50 = vector.shape_cast %49 : vector<1x1x32xf32> to vector<1x32xf32>
    %51 = arith.truncf %44 : vector<8x32xf32> to vector<8x32xbf16>
    %52 = arith.truncf %45 : vector<8x32xf32> to vector<8x32xbf16>
    %53 = arith.truncf %46 : vector<8x32xf32> to vector<8x32xbf16>
    %54 = vector.extract_strided_slice %51 {offsets = [0, 0], sizes = [8, 8], strides = [1, 1]} : vector<8x32xbf16> to vector<8x8xbf16>
    %55 = vector.extract_strided_slice %52 {offsets = [0, 0], sizes = [8, 8], strides = [1, 1]} : vector<8x32xbf16> to vector<8x8xbf16>
    %56 = vector.extract_strided_slice %53 {offsets = [0, 0], sizes = [8, 8], strides = [1, 1]} : vector<8x32xbf16> to vector<8x8xbf16>
    %cst_32 = arith.constant dense<0.000000e+00> : vector<8x8xf32>
    %57 = tpu.matmul %54, %55, %cst_32 {dimension_numbers = #tpu.dot_dimension_numbers<[1], [1], [0], [0], [0, 0, 1, 0], [], []>} : vector<8x8xbf16>, vector<8x8xbf16>, vector<8x8xf32> -> vector<8x8xf32>
    %58 = arith.extf %7 : vector<8x8xbf16> to vector<8x8xf32>
    %59 = arith.addf %57, %58 : vector<8x8xf32>
    %cst_33 = arith.constant dense<0xFF800000> : vector<8xf32>
    %60 = vector.multi_reduction <maximumf>, %59, %cst_33 [1] : vector<8x8xf32> to vector<8xf32>
    %61 = vector.shape_cast %60 : vector<8xf32> to vector<8x1xf32>
    %62 = vector.broadcast %61 : vector<8x1xf32> to vector<8x8xf32>
    %63 = arith.subf %59, %62 : vector<8x8xf32>
    %64 = math.exp %63 : vector<8x8xf32>
    %cst_34 = arith.constant dense<0.000000e+00> : vector<8xf32>
    %65 = vector.multi_reduction <add>, %64, %cst_34 [1] : vector<8x8xf32> to vector<8xf32>
    %66 = vector.shape_cast %65 : vector<8xf32> to vector<8x1xf32>
    %67 = tpu.reciprocal %66 {approx = true} : vector<8x1xf32> -> vector<8x1xf32>
    %68 = vector.broadcast %67 : vector<8x1xf32> to vector<8x8xf32>
    %69 = arith.mulf %64, %68 : vector<8x8xf32>
    %70 = arith.truncf %69 : vector<8x8xf32> to vector<8x8xbf16>
    %cst_35 = arith.constant dense<0.000000e+00> : vector<8x8xf32>
    %71 = tpu.matmul %70, %56, %cst_35 {dimension_numbers = #tpu.dot_dimension_numbers<[1], [0], [0], [1], [0, 0, 1, 1], [], []>} : vector<8x8xbf16>, vector<8x8xbf16>, vector<8x8xf32> -> vector<8x8xf32>
    %72 = vector.extract_strided_slice %51 {offsets = [0, 8], sizes = [8, 8], strides = [1, 1]} : vector<8x32xbf16> to vector<8x8xbf16>
    %73 = vector.extract_strided_slice %52 {offsets = [0, 8], sizes = [8, 8], strides = [1, 1]} : vector<8x32xbf16> to vector<8x8xbf16>
    %74 = vector.extract_strided_slice %53 {offsets = [0, 8], sizes = [8, 8], strides = [1, 1]} : vector<8x32xbf16> to vector<8x8xbf16>
    %cst_36 = arith.constant dense<0.000000e+00> : vector<8x8xf32>
    %75 = tpu.matmul %72, %73, %cst_36 {dimension_numbers = #tpu.dot_dimension_numbers<[1], [1], [0], [0], [0, 0, 1, 0], [], []>} : vector<8x8xbf16>, vector<8x8xbf16>, vector<8x8xf32> -> vector<8x8xf32>
    %76 = arith.extf %7 : vector<8x8xbf16> to vector<8x8xf32>
    %77 = arith.addf %75, %76 : vector<8x8xf32>
    %cst_37 = arith.constant dense<0xFF800000> : vector<8xf32>
    %78 = vector.multi_reduction <maximumf>, %77, %cst_37 [1] : vector<8x8xf32> to vector<8xf32>
    %79 = vector.shape_cast %78 : vector<8xf32> to vector<8x1xf32>
    %80 = vector.broadcast %79 : vector<8x1xf32> to vector<8x8xf32>
    %81 = arith.subf %77, %80 : vector<8x8xf32>
    %82 = math.exp %81 : vector<8x8xf32>
    %cst_38 = arith.constant dense<0.000000e+00> : vector<8xf32>
    %83 = vector.multi_reduction <add>, %82, %cst_38 [1] : vector<8x8xf32> to vector<8xf32>
    %84 = vector.shape_cast %83 : vector<8xf32> to vector<8x1xf32>
    %85 = tpu.reciprocal %84 {approx = true} : vector<8x1xf32> -> vector<8x1xf32>
    %86 = vector.broadcast %85 : vector<8x1xf32> to vector<8x8xf32>
    %87 = arith.mulf %82, %86 : vector<8x8xf32>
    %88 = arith.truncf %87 : vector<8x8xf32> to vector<8x8xbf16>
    %cst_39 = arith.constant dense<0.000000e+00> : vector<8x8xf32>
    %89 = tpu.matmul %88, %74, %cst_39 {dimension_numbers = #tpu.dot_dimension_numbers<[1], [0], [0], [1], [0, 0, 1, 1], [], []>} : vector<8x8xbf16>, vector<8x8xbf16>, vector<8x8xf32> -> vector<8x8xf32>
    %90 = vector.extract_strided_slice %51 {offsets = [0, 16], sizes = [8, 8], strides = [1, 1]} : vector<8x32xbf16> to vector<8x8xbf16>
    %91 = vector.extract_strided_slice %52 {offsets = [0, 16], sizes = [8, 8], strides = [1, 1]} : vector<8x32xbf16> to vector<8x8xbf16>
    %92 = vector.extract_strided_slice %53 {offsets = [0, 16], sizes = [8, 8], strides = [1, 1]} : vector<8x32xbf16> to vector<8x8xbf16>
    %cst_40 = arith.constant dense<0.000000e+00> : vector<8x8xf32>
    %93 = tpu.matmul %90, %91, %cst_40 {dimension_numbers = #tpu.dot_dimension_numbers<[1], [1], [0], [0], [0, 0, 1, 0], [], []>} : vector<8x8xbf16>, vector<8x8xbf16>, vector<8x8xf32> -> vector<8x8xf32>
    %94 = arith.extf %7 : vector<8x8xbf16> to vector<8x8xf32>
    %95 = arith.addf %93, %94 : vector<8x8xf32>
    %cst_41 = arith.constant dense<0xFF800000> : vector<8xf32>
    %96 = vector.multi_reduction <maximumf>, %95, %cst_41 [1] : vector<8x8xf32> to vector<8xf32>
    %97 = vector.shape_cast %96 : vector<8xf32> to vector<8x1xf32>
    %98 = vector.broadcast %97 : vector<8x1xf32> to vector<8x8xf32>
    %99 = arith.subf %95, %98 : vector<8x8xf32>
    %100 = math.exp %99 : vector<8x8xf32>
    %cst_42 = arith.constant dense<0.000000e+00> : vector<8xf32>
    %101 = vector.multi_reduction <add>, %100, %cst_42 [1] : vector<8x8xf32> to vector<8xf32>
    %102 = vector.shape_cast %101 : vector<8xf32> to vector<8x1xf32>
    %103 = tpu.reciprocal %102 {approx = true} : vector<8x1xf32> -> vector<8x1xf32>
    %104 = vector.broadcast %103 : vector<8x1xf32> to vector<8x8xf32>
    %105 = arith.mulf %100, %104 : vector<8x8xf32>
    %106 = arith.truncf %105 : vector<8x8xf32> to vector<8x8xbf16>
    %cst_43 = arith.constant dense<0.000000e+00> : vector<8x8xf32>
    %107 = tpu.matmul %106, %92, %cst_43 {dimension_numbers = #tpu.dot_dimension_numbers<[1], [0], [0], [1], [0, 0, 1, 1], [], []>} : vector<8x8xbf16>, vector<8x8xbf16>, vector<8x8xf32> -> vector<8x8xf32>
    %108 = vector.extract_strided_slice %51 {offsets = [0, 24], sizes = [8, 8], strides = [1, 1]} : vector<8x32xbf16> to vector<8x8xbf16>
    %109 = vector.extract_strided_slice %52 {offsets = [0, 24], sizes = [8, 8], strides = [1, 1]} : vector<8x32xbf16> to vector<8x8xbf16>
    %110 = vector.extract_strided_slice %53 {offsets = [0, 24], sizes = [8, 8], strides = [1, 1]} : vector<8x32xbf16> to vector<8x8xbf16>
    %cst_44 = arith.constant dense<0.000000e+00> : vector<8x8xf32>
    %111 = tpu.matmul %108, %109, %cst_44 {dimension_numbers = #tpu.dot_dimension_numbers<[1], [1], [0], [0], [0, 0, 1, 0], [], []>} : vector<8x8xbf16>, vector<8x8xbf16>, vector<8x8xf32> -> vector<8x8xf32>
    %112 = arith.extf %7 : vector<8x8xbf16> to vector<8x8xf32>
    %113 = arith.addf %111, %112 : vector<8x8xf32>
    %cst_45 = arith.constant dense<0xFF800000> : vector<8xf32>
    %114 = vector.multi_reduction <maximumf>, %113, %cst_45 [1] : vector<8x8xf32> to vector<8xf32>
    %115 = vector.shape_cast %114 : vector<8xf32> to vector<8x1xf32>
    %116 = vector.broadcast %115 : vector<8x1xf32> to vector<8x8xf32>
    %117 = arith.subf %113, %116 : vector<8x8xf32>
    %118 = math.exp %117 : vector<8x8xf32>
    %cst_46 = arith.constant dense<0.000000e+00> : vector<8xf32>
    %119 = vector.multi_reduction <add>, %118, %cst_46 [1] : vector<8x8xf32> to vector<8xf32>
    %120 = vector.shape_cast %119 : vector<8xf32> to vector<8x1xf32>
    %121 = tpu.reciprocal %120 {approx = true} : vector<8x1xf32> -> vector<8x1xf32>
    %122 = vector.broadcast %121 : vector<8x1xf32> to vector<8x8xf32>
    %123 = arith.mulf %118, %122 : vector<8x8xf32>
    %124 = arith.truncf %123 : vector<8x8xf32> to vector<8x8xbf16>
    %cst_47 = arith.constant dense<0.000000e+00> : vector<8x8xf32>
    %125 = tpu.matmul %124, %110, %cst_47 {dimension_numbers = #tpu.dot_dimension_numbers<[1], [0], [0], [1], [0, 0, 1, 1], [], []>} : vector<8x8xbf16>, vector<8x8xbf16>, vector<8x8xf32> -> vector<8x8xf32>
    %126 = tpu.concatenate %71, %89, %107, %125 in 1 : vector<8x8xf32>, vector<8x8xf32>, vector<8x8xf32>, vector<8x8xf32> -> vector<8x32xf32>
    %127 = arith.truncf %126 : vector<8x32xf32> to vector<8x32xbf16>
    %cst_48 = arith.constant dense<0.000000e+00> : vector<8x32xf32>
    %128 = tpu.matmul %127, %48, %cst_48 {dimension_numbers = #tpu.dot_dimension_numbers<[1], [0], [0], [1], [0, 0, 1, 1], [], []>} : vector<8x32xbf16>, vector<32x32xbf16>, vector<8x32xf32> -> vector<8x32xf32>
    %129 = vector.broadcast %50 : vector<1x32xf32> to vector<8x32xf32>
    %130 = arith.addf %128, %129 : vector<8x32xf32>
    %131 = arith.addf %4, %130 : vector<8x32xf32>
    %c0_49 = arith.constant 0 : index
    %c1 = arith.constant 1 : index
    %c0_50 = arith.constant 0 : index
    %132 = vector.load %arg6[%c0_49, %c1, %c0_50] : memref<1x3x32xf32, #tpu.memory_space<vmem>>, vector<1x1x32xf32>
    %133 = vector.shape_cast %132 : vector<1x1x32xf32> to vector<32xf32>
    %c0_51 = arith.constant 0 : index
    %c1_52 = arith.constant 1 : index
    %c0_53 = arith.constant 0 : index
    %134 = vector.load %arg7[%c0_51, %c1_52, %c0_53] : memref<1x3x32xf32, #tpu.memory_space<vmem>>, vector<1x1x32xf32>
    %135 = vector.shape_cast %134 : vector<1x1x32xf32> to vector<32xf32>
    %cst_54 = arith.constant dense<0.000000e+00> : vector<8xf32>
    %136 = vector.multi_reduction <add>, %131, %cst_54 [1] : vector<8x32xf32> to vector<8xf32>
    %137 = vector.shape_cast %136 : vector<8xf32> to vector<8x1xf32>
    %cst_55 = arith.constant 3.200000e+01 : f32
    %138 = vector.broadcast %cst_55 : f32 to vector<8x1xf32>
    %139 = arith.divf %137, %138 : vector<8x1xf32>
    %140 = vector.broadcast %139 : vector<8x1xf32> to vector<8x32xf32>
    %141 = arith.subf %131, %140 : vector<8x32xf32>
    %142 = arith.mulf %141, %141 : vector<8x32xf32>
    %cst_56 = arith.constant dense<0.000000e+00> : vector<8xf32>
    %143 = vector.multi_reduction <add>, %142, %cst_56 [1] : vector<8x32xf32> to vector<8xf32>
    %144 = vector.shape_cast %143 : vector<8xf32> to vector<8x1xf32>
    %cst_57 = arith.constant 0.0322580636 : f32
    %145 = vector.broadcast %cst_57 : f32 to vector<8x1xf32>
    %146 = arith.mulf %144, %145 : vector<8x1xf32>
    %147 = math.sqrt %146 : vector<8x1xf32>
    %cst_58 = arith.constant 9.99999997E-7 : f32
    %148 = vector.broadcast %cst_58 : f32 to vector<8x1xf32>
    %149 = arith.addf %147, %148 : vector<8x1xf32>
    %cst_59 = arith.constant 1.000000e+00 : f32
    %150 = vector.broadcast %cst_59 : f32 to vector<8x1xf32>
    %151 = arith.divf %150, %149 : vector<8x1xf32>
    %152 = vector.broadcast %151 : vector<8x1xf32> to vector<8x32xf32>
    %153 = arith.mulf %141, %152 : vector<8x32xf32>
    %154 = vector.shape_cast %133 : vector<32xf32> to vector<1x32xf32>
    %155 = vector.broadcast %154 : vector<1x32xf32> to vector<8x32xf32>
    %156 = arith.mulf %155, %153 : vector<8x32xf32>
    %157 = vector.shape_cast %135 : vector<32xf32> to vector<1x32xf32>
    %158 = vector.broadcast %157 : vector<1x32xf32> to vector<8x32xf32>
    %159 = arith.addf %156, %158 : vector<8x32xf32>
    %160 = arith.truncf %159 : vector<8x32xf32> to vector<8x32xbf16>
    %c0_60 = arith.constant 0 : index
    %c0_61 = arith.constant 0 : index
    %c0_62 = arith.constant 0 : index
    %161 = vector.load %arg12[%c0_60, %c0_61, %c0_62] : memref<1x32x32xbf16, #tpu.memory_space<vmem>>, vector<1x32x32xbf16>
    %162 = vector.shape_cast %161 : vector<1x32x32xbf16> to vector<32x32xbf16>
    %cst_63 = arith.constant dense<0.000000e+00> : vector<8x32xf32>
    %163 = tpu.matmul %160, %162, %cst_63 {dimension_numbers = #tpu.dot_dimension_numbers<[1], [0], [0], [1], [0, 0, 1, 1], [], []>} : vector<8x32xbf16>, vector<32x32xbf16>, vector<8x32xf32> -> vector<8x32xf32>
    %c0_64 = arith.constant 0 : index
    %c0_65 = arith.constant 0 : index
    %c0_66 = arith.constant 0 : index
    %164 = vector.load %arg13[%c0_64, %c0_65, %c0_66] : memref<1x1x32xf32, #tpu.memory_space<vmem>>, vector<1x1x32xf32>
    %165 = vector.shape_cast %164 : vector<1x1x32xf32> to vector<1x32xf32>
    %166 = vector.broadcast %165 : vector<1x32xf32> to vector<8x32xf32>
    %167 = arith.addf %163, %166 : vector<8x32xf32>
    %c0_67 = arith.constant 0 : index
    %c0_68 = arith.constant 0 : index
    %c0_69 = arith.constant 0 : index
    %168 = vector.load %arg14[%c0_67, %c0_68, %c0_69] : memref<1x32x64xbf16, #tpu.memory_space<vmem>>, vector<1x32x64xbf16>
    %169 = vector.shape_cast %168 : vector<1x32x64xbf16> to vector<32x64xbf16>
    %cst_70 = arith.constant dense<0.000000e+00> : vector<16x64xf32>
    %170 = tpu.matmul %6, %169, %cst_70 {dimension_numbers = #tpu.dot_dimension_numbers<[1], [0], [0], [1], [0, 0, 1, 1], [], []>} : vector<16x32xbf16>, vector<32x64xbf16>, vector<16x64xf32> -> vector<16x64xf32>
    %c0_71 = arith.constant 0 : index
    %c0_72 = arith.constant 0 : index
    %c0_73 = arith.constant 0 : index
    %171 = vector.load %arg15[%c0_71, %c0_72, %c0_73] : memref<1x1x64xf32, #tpu.memory_space<vmem>>, vector<1x1x64xf32>
    %172 = vector.shape_cast %171 : vector<1x1x64xf32> to vector<1x64xf32>
    %173 = vector.broadcast %172 : vector<1x64xf32> to vector<16x64xf32>
    %174 = arith.addf %170, %173 : vector<16x64xf32>
    %175 = vector.extract_strided_slice %174 {offsets = [0, 0], sizes = [16, 32], strides = [1, 1]} : vector<16x64xf32> to vector<16x32xf32>
    %176 = vector.extract_strided_slice %174 {offsets = [0, 32], sizes = [16, 32], strides = [1, 1]} : vector<16x64xf32> to vector<16x32xf32>
    %c0_74 = arith.constant 0 : index
    %c0_75 = arith.constant 0 : index
    %c0_76 = arith.constant 0 : index
    %177 = vector.load %arg16[%c0_74, %c0_75, %c0_76] : memref<1x32x32xbf16, #tpu.memory_space<vmem>>, vector<1x32x32xbf16>
    %178 = vector.shape_cast %177 : vector<1x32x32xbf16> to vector<32x32xbf16>
    %c0_77 = arith.constant 0 : index
    %c0_78 = arith.constant 0 : index
    %c0_79 = arith.constant 0 : index
    %179 = vector.load %arg17[%c0_77, %c0_78, %c0_79] : memref<1x1x32xf32, #tpu.memory_space<vmem>>, vector<1x1x32xf32>
    %180 = vector.shape_cast %179 : vector<1x1x32xf32> to vector<1x32xf32>
    %181 = arith.truncf %167 : vector<8x32xf32> to vector<8x32xbf16>
    %182 = arith.truncf %175 : vector<16x32xf32> to vector<16x32xbf16>
    %183 = arith.truncf %176 : vector<16x32xf32> to vector<16x32xbf16>
    %184 = vector.extract_strided_slice %181 {offsets = [0, 0], sizes = [8, 8], strides = [1, 1]} : vector<8x32xbf16> to vector<8x8xbf16>
    %185 = vector.extract_strided_slice %182 {offsets = [0, 0], sizes = [16, 8], strides = [1, 1]} : vector<16x32xbf16> to vector<16x8xbf16>
    %186 = vector.extract_strided_slice %183 {offsets = [0, 0], sizes = [16, 8], strides = [1, 1]} : vector<16x32xbf16> to vector<16x8xbf16>
    %cst_80 = arith.constant dense<0.000000e+00> : vector<8x16xf32>
    %187 = tpu.matmul %184, %185, %cst_80 {dimension_numbers = #tpu.dot_dimension_numbers<[1], [1], [0], [0], [0, 0, 1, 0], [], []>} : vector<8x8xbf16>, vector<16x8xbf16>, vector<8x16xf32> -> vector<8x16xf32>
    %cst_81 = arith.constant dense<0xFF800000> : vector<8xf32>
    %188 = vector.multi_reduction <maximumf>, %187, %cst_81 [1] : vector<8x16xf32> to vector<8xf32>
    %189 = vector.shape_cast %188 : vector<8xf32> to vector<8x1xf32>
    %190 = vector.broadcast %189 : vector<8x1xf32> to vector<8x16xf32>
    %191 = arith.subf %187, %190 : vector<8x16xf32>
    %192 = math.exp %191 : vector<8x16xf32>
    %cst_82 = arith.constant dense<0.000000e+00> : vector<8xf32>
    %193 = vector.multi_reduction <add>, %192, %cst_82 [1] : vector<8x16xf32> to vector<8xf32>
    %194 = vector.shape_cast %193 : vector<8xf32> to vector<8x1xf32>
    %195 = tpu.reciprocal %194 {approx = true} : vector<8x1xf32> -> vector<8x1xf32>
    %196 = vector.broadcast %195 : vector<8x1xf32> to vector<8x16xf32>
    %197 = arith.mulf %192, %196 : vector<8x16xf32>
    %198 = arith.truncf %197 : vector<8x16xf32> to vector<8x16xbf16>
    %cst_83 = arith.constant dense<0.000000e+00> : vector<8x8xf32>
    %199 = tpu.matmul %198, %186, %cst_83 {dimension_numbers = #tpu.dot_dimension_numbers<[1], [0], [0], [1], [0, 0, 1, 1], [], []>} : vector<8x16xbf16>, vector<16x8xbf16>, vector<8x8xf32> -> vector<8x8xf32>
    %200 = vector.extract_strided_slice %181 {offsets = [0, 8], sizes = [8, 8], strides = [1, 1]} : vector<8x32xbf16> to vector<8x8xbf16>
    %201 = vector.extract_strided_slice %182 {offsets = [0, 8], sizes = [16, 8], strides = [1, 1]} : vector<16x32xbf16> to vector<16x8xbf16>
    %202 = vector.extract_strided_slice %183 {offsets = [0, 8], sizes = [16, 8], strides = [1, 1]} : vector<16x32xbf16> to vector<16x8xbf16>
    %cst_84 = arith.constant dense<0.000000e+00> : vector<8x16xf32>
    %203 = tpu.matmul %200, %201, %cst_84 {dimension_numbers = #tpu.dot_dimension_numbers<[1], [1], [0], [0], [0, 0, 1, 0], [], []>} : vector<8x8xbf16>, vector<16x8xbf16>, vector<8x16xf32> -> vector<8x16xf32>
    %cst_85 = arith.constant dense<0xFF800000> : vector<8xf32>
    %204 = vector.multi_reduction <maximumf>, %203, %cst_85 [1] : vector<8x16xf32> to vector<8xf32>
    %205 = vector.shape_cast %204 : vector<8xf32> to vector<8x1xf32>
    %206 = vector.broadcast %205 : vector<8x1xf32> to vector<8x16xf32>
    %207 = arith.subf %203, %206 : vector<8x16xf32>
    %208 = math.exp %207 : vector<8x16xf32>
    %cst_86 = arith.constant dense<0.000000e+00> : vector<8xf32>
    %209 = vector.multi_reduction <add>, %208, %cst_86 [1] : vector<8x16xf32> to vector<8xf32>
    %210 = vector.shape_cast %209 : vector<8xf32> to vector<8x1xf32>
    %211 = tpu.reciprocal %210 {approx = true} : vector<8x1xf32> -> vector<8x1xf32>
    %212 = vector.broadcast %211 : vector<8x1xf32> to vector<8x16xf32>
    %213 = arith.mulf %208, %212 : vector<8x16xf32>
    %214 = arith.truncf %213 : vector<8x16xf32> to vector<8x16xbf16>
    %cst_87 = arith.constant dense<0.000000e+00> : vector<8x8xf32>
    %215 = tpu.matmul %214, %202, %cst_87 {dimension_numbers = #tpu.dot_dimension_numbers<[1], [0], [0], [1], [0, 0, 1, 1], [], []>} : vector<8x16xbf16>, vector<16x8xbf16>, vector<8x8xf32> -> vector<8x8xf32>
    %216 = vector.extract_strided_slice %181 {offsets = [0, 16], sizes = [8, 8], strides = [1, 1]} : vector<8x32xbf16> to vector<8x8xbf16>
    %217 = vector.extract_strided_slice %182 {offsets = [0, 16], sizes = [16, 8], strides = [1, 1]} : vector<16x32xbf16> to vector<16x8xbf16>
    %218 = vector.extract_strided_slice %183 {offsets = [0, 16], sizes = [16, 8], strides = [1, 1]} : vector<16x32xbf16> to vector<16x8xbf16>
    %cst_88 = arith.constant dense<0.000000e+00> : vector<8x16xf32>
    %219 = tpu.matmul %216, %217, %cst_88 {dimension_numbers = #tpu.dot_dimension_numbers<[1], [1], [0], [0], [0, 0, 1, 0], [], []>} : vector<8x8xbf16>, vector<16x8xbf16>, vector<8x16xf32> -> vector<8x16xf32>
    %cst_89 = arith.constant dense<0xFF800000> : vector<8xf32>
    %220 = vector.multi_reduction <maximumf>, %219, %cst_89 [1] : vector<8x16xf32> to vector<8xf32>
    %221 = vector.shape_cast %220 : vector<8xf32> to vector<8x1xf32>
    %222 = vector.broadcast %221 : vector<8x1xf32> to vector<8x16xf32>
    %223 = arith.subf %219, %222 : vector<8x16xf32>
    %224 = math.exp %223 : vector<8x16xf32>
    %cst_90 = arith.constant dense<0.000000e+00> : vector<8xf32>
    %225 = vector.multi_reduction <add>, %224, %cst_90 [1] : vector<8x16xf32> to vector<8xf32>
    %226 = vector.shape_cast %225 : vector<8xf32> to vector<8x1xf32>
    %227 = tpu.reciprocal %226 {approx = true} : vector<8x1xf32> -> vector<8x1xf32>
    %228 = vector.broadcast %227 : vector<8x1xf32> to vector<8x16xf32>
    %229 = arith.mulf %224, %228 : vector<8x16xf32>
    %230 = arith.truncf %229 : vector<8x16xf32> to vector<8x16xbf16>
    %cst_91 = arith.constant dense<0.000000e+00> : vector<8x8xf32>
    %231 = tpu.matmul %230, %218, %cst_91 {dimension_numbers = #tpu.dot_dimension_numbers<[1], [0], [0], [1], [0, 0, 1, 1], [], []>} : vector<8x16xbf16>, vector<16x8xbf16>, vector<8x8xf32> -> vector<8x8xf32>
    %232 = vector.extract_strided_slice %181 {offsets = [0, 24], sizes = [8, 8], strides = [1, 1]} : vector<8x32xbf16> to vector<8x8xbf16>
    %233 = vector.extract_strided_slice %182 {offsets = [0, 24], sizes = [16, 8], strides = [1, 1]} : vector<16x32xbf16> to vector<16x8xbf16>
    %234 = vector.extract_strided_slice %183 {offsets = [0, 24], sizes = [16, 8], strides = [1, 1]} : vector<16x32xbf16> to vector<16x8xbf16>
    %cst_92 = arith.constant dense<0.000000e+00> : vector<8x16xf32>
    %235 = tpu.matmul %232, %233, %cst_92 {dimension_numbers = #tpu.dot_dimension_numbers<[1], [1], [0], [0], [0, 0, 1, 0], [], []>} : vector<8x8xbf16>, vector<16x8xbf16>, vector<8x16xf32> -> vector<8x16xf32>
    %cst_93 = arith.constant dense<0xFF800000> : vector<8xf32>
    %236 = vector.multi_reduction <maximumf>, %235, %cst_93 [1] : vector<8x16xf32> to vector<8xf32>
    %237 = vector.shape_cast %236 : vector<8xf32> to vector<8x1xf32>
    %238 = vector.broadcast %237 : vector<8x1xf32> to vector<8x16xf32>
    %239 = arith.subf %235, %238 : vector<8x16xf32>
    %240 = math.exp %239 : vector<8x16xf32>
    %cst_94 = arith.constant dense<0.000000e+00> : vector<8xf32>
    %241 = vector.multi_reduction <add>, %240, %cst_94 [1] : vector<8x16xf32> to vector<8xf32>
    %242 = vector.shape_cast %241 : vector<8xf32> to vector<8x1xf32>
    %243 = tpu.reciprocal %242 {approx = true} : vector<8x1xf32> -> vector<8x1xf32>
    %244 = vector.broadcast %243 : vector<8x1xf32> to vector<8x16xf32>
    %245 = arith.mulf %240, %244 : vector<8x16xf32>
    %246 = arith.truncf %245 : vector<8x16xf32> to vector<8x16xbf16>
    %cst_95 = arith.constant dense<0.000000e+00> : vector<8x8xf32>
    %247 = tpu.matmul %246, %234, %cst_95 {dimension_numbers = #tpu.dot_dimension_numbers<[1], [0], [0], [1], [0, 0, 1, 1], [], []>} : vector<8x16xbf16>, vector<16x8xbf16>, vector<8x8xf32> -> vector<8x8xf32>
    %248 = tpu.concatenate %199, %215, %231, %247 in 1 : vector<8x8xf32>, vector<8x8xf32>, vector<8x8xf32>, vector<8x8xf32> -> vector<8x32xf32>
    %249 = arith.truncf %248 : vector<8x32xf32> to vector<8x32xbf16>
    %cst_96 = arith.constant dense<0.000000e+00> : vector<8x32xf32>
    %250 = tpu.matmul %249, %178, %cst_96 {dimension_numbers = #tpu.dot_dimension_numbers<[1], [0], [0], [1], [0, 0, 1, 1], [], []>} : vector<8x32xbf16>, vector<32x32xbf16>, vector<8x32xf32> -> vector<8x32xf32>
    %251 = vector.broadcast %180 : vector<1x32xf32> to vector<8x32xf32>
    %252 = arith.addf %250, %251 : vector<8x32xf32>
    %253 = arith.addf %131, %252 : vector<8x32xf32>
    %c0_97 = arith.constant 0 : index
    %c2 = arith.constant 2 : index
    %c0_98 = arith.constant 0 : index
    %254 = vector.load %arg6[%c0_97, %c2, %c0_98] : memref<1x3x32xf32, #tpu.memory_space<vmem>>, vector<1x1x32xf32>
    %255 = vector.shape_cast %254 : vector<1x1x32xf32> to vector<32xf32>
    %c0_99 = arith.constant 0 : index
    %c2_100 = arith.constant 2 : index
    %c0_101 = arith.constant 0 : index
    %256 = vector.load %arg7[%c0_99, %c2_100, %c0_101] : memref<1x3x32xf32, #tpu.memory_space<vmem>>, vector<1x1x32xf32>
    %257 = vector.shape_cast %256 : vector<1x1x32xf32> to vector<32xf32>
    %cst_102 = arith.constant dense<0.000000e+00> : vector<8xf32>
    %258 = vector.multi_reduction <add>, %253, %cst_102 [1] : vector<8x32xf32> to vector<8xf32>
    %259 = vector.shape_cast %258 : vector<8xf32> to vector<8x1xf32>
    %cst_103 = arith.constant 3.200000e+01 : f32
    %260 = vector.broadcast %cst_103 : f32 to vector<8x1xf32>
    %261 = arith.divf %259, %260 : vector<8x1xf32>
    %262 = vector.broadcast %261 : vector<8x1xf32> to vector<8x32xf32>
    %263 = arith.subf %253, %262 : vector<8x32xf32>
    %264 = arith.mulf %263, %263 : vector<8x32xf32>
    %cst_104 = arith.constant dense<0.000000e+00> : vector<8xf32>
    %265 = vector.multi_reduction <add>, %264, %cst_104 [1] : vector<8x32xf32> to vector<8xf32>
    %266 = vector.shape_cast %265 : vector<8xf32> to vector<8x1xf32>
    %cst_105 = arith.constant 0.0322580636 : f32
    %267 = vector.broadcast %cst_105 : f32 to vector<8x1xf32>
    %268 = arith.mulf %266, %267 : vector<8x1xf32>
    %269 = math.sqrt %268 : vector<8x1xf32>
    %cst_106 = arith.constant 9.99999997E-7 : f32
    %270 = vector.broadcast %cst_106 : f32 to vector<8x1xf32>
    %271 = arith.addf %269, %270 : vector<8x1xf32>
    %cst_107 = arith.constant 1.000000e+00 : f32
    %272 = vector.broadcast %cst_107 : f32 to vector<8x1xf32>
    %273 = arith.divf %272, %271 : vector<8x1xf32>
    %274 = vector.broadcast %273 : vector<8x1xf32> to vector<8x32xf32>
    %275 = arith.mulf %263, %274 : vector<8x32xf32>
    %276 = vector.shape_cast %255 : vector<32xf32> to vector<1x32xf32>
    %277 = vector.broadcast %276 : vector<1x32xf32> to vector<8x32xf32>
    %278 = arith.mulf %277, %275 : vector<8x32xf32>
    %279 = vector.shape_cast %257 : vector<32xf32> to vector<1x32xf32>
    %280 = vector.broadcast %279 : vector<1x32xf32> to vector<8x32xf32>
    %281 = arith.addf %278, %280 : vector<8x32xf32>
    %282 = arith.truncf %281 : vector<8x32xf32> to vector<8x32xbf16>
    %cst_108 = arith.constant 0.000000e+00 : f32
    %283 = vector.broadcast %cst_108 : f32 to vector<8x32xf32>
    %c0_109 = arith.constant 0 : index
    %c0_110 = arith.constant 0 : index
    %c0_111 = arith.constant 0 : index
    %284 = vector.load %arg18[%c0_109, %c0_110, %c0_111] : memref<1x32x64xbf16, #tpu.memory_space<vmem>>, vector<1x32x64xbf16>
    %285 = vector.shape_cast %284 : vector<1x32x64xbf16> to vector<32x64xbf16>
    %cst_112 = arith.constant dense<0.000000e+00> : vector<8x64xf32>
    %286 = tpu.matmul %282, %285, %cst_112 {dimension_numbers = #tpu.dot_dimension_numbers<[1], [0], [0], [1], [0, 0, 1, 1], [], []>} : vector<8x32xbf16>, vector<32x64xbf16>, vector<8x64xf32> -> vector<8x64xf32>
    %c0_113 = arith.constant 0 : index
    %c0_114 = arith.constant 0 : index
    %c0_115 = arith.constant 0 : index
    %287 = vector.load %arg19[%c0_113, %c0_114, %c0_115] : memref<1x1x64xf32, #tpu.memory_space<vmem>>, vector<1x1x64xf32>
    %288 = vector.shape_cast %287 : vector<1x1x64xf32> to vector<1x64xf32>
    %289 = vector.broadcast %288 : vector<1x64xf32> to vector<8x64xf32>
    %290 = arith.addf %286, %289 : vector<8x64xf32>
    %cst_116 = arith.constant 0.000000e+00 : f32
    %291 = vector.broadcast %cst_116 : f32 to vector<8x64xf32>
    %292 = arith.maximumf %290, %291 : vector<8x64xf32>
    %293 = arith.truncf %292 : vector<8x64xf32> to vector<8x64xbf16>
    %c0_117 = arith.constant 0 : index
    %c0_118 = arith.constant 0 : index
    %c0_119 = arith.constant 0 : index
    %294 = vector.load %arg20[%c0_117, %c0_118, %c0_119] : memref<1x64x32xbf16, #tpu.memory_space<vmem>>, vector<1x64x32xbf16>
    %295 = vector.shape_cast %294 : vector<1x64x32xbf16> to vector<64x32xbf16>
    %cst_120 = arith.constant dense<0.000000e+00> : vector<8x32xf32>
    %296 = tpu.matmul %293, %295, %cst_120 {dimension_numbers = #tpu.dot_dimension_numbers<[1], [0], [0], [1], [0, 0, 1, 1], [], []>} : vector<8x64xbf16>, vector<64x32xbf16>, vector<8x32xf32> -> vector<8x32xf32>
    %297 = arith.addf %283, %296 : vector<8x32xf32>
    %298 = arith.addf %253, %297 : vector<8x32xf32>
    %c0_121 = arith.constant 0 : index
    %c0_122 = arith.constant 0 : index
    %c0_123 = arith.constant 0 : index
    %299 = vector.load %arg21[%c0_121, %c0_122, %c0_123] : memref<1x1x32xf32, #tpu.memory_space<vmem>>, vector<1x1x32xf32>
    %300 = vector.shape_cast %299 : vector<1x1x32xf32> to vector<1x32xf32>
    %301 = vector.broadcast %300 : vector<1x32xf32> to vector<8x32xf32>
    %302 = arith.addf %298, %301 : vector<8x32xf32>
    %c0_124 = arith.constant 0 : index
    %c0_125 = arith.constant 0 : index
    %c0_126 = arith.constant 0 : index
    %303 = vector.load %arg25[%c0_124, %c0_125, %c0_126] : memref<1x8x32xf32, #tpu.memory_space<vmem>>, vector<1x8x32xf32>
    %304 = vector.shape_cast %303 : vector<1x8x32xf32> to vector<8x32xf32>
    %305 = vector.shape_cast %302 : vector<8x32xf32> to vector<1x8x32xf32>
    tpu.vector_store %arg25[%c0_124, %c0_125, %c0_126], %305 {strides = array<i32>} : memref<1x8x32xf32, #tpu.memory_space<vmem>>, vector<1x8x32xf32>,
    %c1_i32 = arith.constant 1 : i32
    %306 = arith.cmpi eq, %arg1, %c1_i32 : i32
    %307 = arith.extui %306 : i1 to i32
    %c0_i32_127 = arith.constant 0 : i32
    %308 = arith.cmpi ne, %307, %c0_i32_127 : i32
    scf.if %308 {
      %c0_130 = arith.constant 0 : index
      %c0_131 = arith.constant 0 : index
      %312 = vector.load %arg22[%c0_130, %c0_131] : memref<1x32xf32, #tpu.memory_space<vmem>>, vector<1x32xf32>
      %313 = vector.shape_cast %312 : vector<1x32xf32> to vector<32xf32>
      %c0_132 = arith.constant 0 : index
      %c0_133 = arith.constant 0 : index
      %314 = vector.load %arg23[%c0_132, %c0_133] : memref<1x32xf32, #tpu.memory_space<vmem>>, vector<1x32xf32>
      %315 = vector.shape_cast %314 : vector<1x32xf32> to vector<32xf32>
      %cst_134 = arith.constant dense<0.000000e+00> : vector<8xf32>
      %316 = vector.multi_reduction <add>, %302, %cst_134 [1] : vector<8x32xf32> to vector<8xf32>
      %317 = vector.shape_cast %316 : vector<8xf32> to vector<8x1xf32>
      %cst_135 = arith.constant 3.200000e+01 : f32
      %318 = vector.broadcast %cst_135 : f32 to vector<8x1xf32>
      %319 = arith.divf %317, %318 : vector<8x1xf32>
      %320 = vector.broadcast %319 : vector<8x1xf32> to vector<8x32xf32>
      %321 = arith.subf %302, %320 : vector<8x32xf32>
      %322 = arith.mulf %321, %321 : vector<8x32xf32>
      %cst_136 = arith.constant dense<0.000000e+00> : vector<8xf32>
      %323 = vector.multi_reduction <add>, %322, %cst_136 [1] : vector<8x32xf32> to vector<8xf32>
      %324 = vector.shape_cast %323 : vector<8xf32> to vector<8x1xf32>
      %cst_137 = arith.constant 0.0322580636 : f32
      %325 = vector.broadcast %cst_137 : f32 to vector<8x1xf32>
      %326 = arith.mulf %324, %325 : vector<8x1xf32>
      %327 = math.sqrt %326 : vector<8x1xf32>
      %cst_138 = arith.constant 9.99999997E-7 : f32
      %328 = vector.broadcast %cst_138 : f32 to vector<8x1xf32>
      %329 = arith.addf %327, %328 : vector<8x1xf32>
      %cst_139 = arith.constant 1.000000e+00 : f32
      %330 = vector.broadcast %cst_139 : f32 to vector<8x1xf32>
      %331 = arith.divf %330, %329 : vector<8x1xf32>
      %332 = vector.broadcast %331 : vector<8x1xf32> to vector<8x32xf32>
      %333 = arith.mulf %321, %332 : vector<8x32xf32>
      %334 = vector.shape_cast %313 : vector<32xf32> to vector<1x32xf32>
      %335 = vector.broadcast %334 : vector<1x32xf32> to vector<8x32xf32>
      %336 = arith.mulf %335, %333 : vector<8x32xf32>
      %337 = vector.shape_cast %315 : vector<32xf32> to vector<1x32xf32>
      %338 = vector.broadcast %337 : vector<1x32xf32> to vector<8x32xf32>
      %339 = arith.addf %336, %338 : vector<8x32xf32>
      %c0_140 = arith.constant 0 : index
      %c0_141 = arith.constant 0 : index
      %c0_142 = arith.constant 0 : index
      %340 = vector.load %arg24[%c0_140, %c0_141, %c0_142] : memref<1x8x32xf32, #tpu.memory_space<vmem>>, vector<1x8x32xf32>
      %341 = vector.shape_cast %340 : vector<1x8x32xf32> to vector<8x32xf32>
      %342 = vector.shape_cast %339 : vector<8x32xf32> to vector<1x8x32xf32>
      tpu.vector_store %arg24[%c0_140, %c0_141, %c0_142], %342 {strides = array<i32>} : memref<1x8x32xf32, #tpu.memory_space<vmem>>, vector<1x8x32xf32>,
    } else {
    }
    %c1_i32_128 = arith.constant 1 : i32
    %309 = arith.cmpi ne, %arg1, %c1_i32_128 : i32
    %310 = arith.extui %309 : i1 to i32
    %c0_i32_129 = arith.constant 0 : i32
    %311 = arith.cmpi ne, %310, %c0_i32_129 : i32
    scf.if %311 {
      %c0_130 = arith.constant 0 : index
      %c0_131 = arith.constant 0 : index
      %c0_132 = arith.constant 0 : index
      %312 = vector.load %arg24[%c0_130, %c0_131, %c0_132] : memref<1x8x32xf32, #tpu.memory_space<vmem>>, vector<1x8x32xf32>
      %313 = vector.shape_cast %312 : vector<1x8x32xf32> to vector<8x32xf32>
      %314 = vector.shape_cast %302 : vector<8x32xf32> to vector<1x8x32xf32>
      tpu.vector_store %arg24[%c0_130, %c0_131, %c0_132], %314 {strides = array<i32>} : memref<1x8x32xf32, #tpu.memory_space<vmem>>, vector<1x8x32xf32>,
    } else {
    }
    return
  }
  func.func @transform_0(%arg0: i32, %arg1: i32) -> (i32, i32, i32) {
    %c0_i32 = arith.constant 0 : i32
    %c0_i32_0 = arith.constant 0 : i32
    %c0_i32_1 = arith.constant 0 : i32
    return %arg0, %c0_i32, %c0_i32_0 : i32, i32, i32
  }
  func.func @transform_1(%arg0: i32, %arg1: i32) -> (i32, i32, i32) {
    %c0_i32 = arith.constant 0 : i32
    %c0_i32_0 = arith.constant 0 : i32
    %c0_i32_1 = arith.constant 0 : i32
    return %arg0, %c0_i32, %c0_i32_0 : i32, i32, i32
  }
  func.func @transform_2(%arg0: i32, %arg1: i32) -> (i32, i32) {
    %c0_i32 = arith.constant 0 : i32
    %c0_i32_0 = arith.constant 0 : i32
    %c0_i32_1 = arith.constant 0 : i32
    return %c0_i32, %c0_i32_0 : i32, i32
  }
  func.func @transform_3(%arg0: i32, %arg1: i32) -> (i32, i32) {
    %c0_i32 = arith.constant 0 : i32
    %c0_i32_0 = arith.constant 0 : i32
    %c0_i32_1 = arith.constant 0 : i32
    return %c0_i32, %c0_i32_0 : i32, i32
  }
  func.func @transform_4(%arg0: i32, %arg1: i32) -> (i32, i32, i32) {
    %c0_i32 = arith.constant 0 : i32
    %c0_i32_0 = arith.constant 0 : i32
    %c0_i32_1 = arith.constant 0 : i32
    return %arg1, %c0_i32, %c0_i32_0 : i32, i32, i32
  }
  func.func @transform_5(%arg0: i32, %arg1: i32) -> (i32, i32, i32) {
    %c0_i32 = arith.constant 0 : i32
    %c0_i32_0 = arith.constant 0 : i32
    %c0_i32_1 = arith.constant 0 : i32
    return %arg1, %c0_i32, %c0_i32_0 : i32, i32, i32
  }
  func.func @transform_6(%arg0: i32, %arg1: i32) -> (i32, i32, i32) {
    %c0_i32 = arith.constant 0 : i32
    %c0_i32_0 = arith.constant 0 : i32
    %c0_i32_1 = arith.constant 0 : i32
    return %arg1, %c0_i32, %c0_i32_0 : i32, i32, i32
  }
  func.func @transform_7(%arg0: i32, %arg1: i32) -> (i32, i32, i32) {
    %c0_i32 = arith.constant 0 : i32
    %c0_i32_0 = arith.constant 0 : i32
    %c0_i32_1 = arith.constant 0 : i32
    return %arg1, %c0_i32, %c0_i32_0 : i32, i32, i32
  }
  func.func @transform_8(%arg0: i32, %arg1: i32) -> (i32, i32, i32) {
    %c0_i32 = arith.constant 0 : i32
    %c0_i32_0 = arith.constant 0 : i32
    %c0_i32_1 = arith.constant 0 : i32
    return %arg1, %c0_i32, %c0_i32_0 : i32, i32, i32
  }
  func.func @transform_9(%arg0: i32, %arg1: i32) -> (i32, i32, i32) {
    %c0_i32 = arith.constant 0 : i32
    %c0_i32_0 = arith.constant 0 : i32
    %c0_i32_1 = arith.constant 0 : i32
    return %arg1, %c0_i32, %c0_i32_0 : i32, i32, i32
  }
  func.func @transform_10(%arg0: i32, %arg1: i32) -> (i32, i32, i32) {
    %c0_i32 = arith.constant 0 : i32
    %c0_i32_0 = arith.constant 0 : i32
    %c0_i32_1 = arith.constant 0 : i32
    return %arg1, %c0_i32, %c0_i32_0 : i32, i32, i32
  }
  func.func @transform_11(%arg0: i32, %arg1: i32) -> (i32, i32, i32) {
    %c0_i32 = arith.constant 0 : i32
    %c0_i32_0 = arith.constant 0 : i32
    %c0_i32_1 = arith.constant 0 : i32
    return %arg1, %c0_i32, %c0_i32_0 : i32, i32, i32
  }
  func.func @transform_12(%arg0: i32, %arg1: i32) -> (i32, i32, i32) {
    %c0_i32 = arith.constant 0 : i32
    %c0_i32_0 = arith.constant 0 : i32
    %c0_i32_1 = arith.constant 0 : i32
    return %arg1, %c0_i32, %c0_i32_0 : i32, i32, i32
  }
  func.func @transform_13(%arg0: i32, %arg1: i32) -> (i32, i32, i32) {
    %c0_i32 = arith.constant 0 : i32
    %c0_i32_0 = arith.constant 0 : i32
    %c0_i32_1 = arith.constant 0 : i32
    return %arg1, %c0_i32, %c0_i32_0 : i32, i32, i32
  }
  func.func @transform_14(%arg0: i32, %arg1: i32) -> (i32, i32, i32) {
    %c0_i32 = arith.constant 0 : i32
    %c0_i32_0 = arith.constant 0 : i32
    %c0_i32_1 = arith.constant 0 : i32
    return %arg1, %c0_i32, %c0_i32_0 : i32, i32, i32
  }
  func.func @transform_15(%arg0: i32, %arg1: i32) -> (i32, i32, i32) {
    %c0_i32 = arith.constant 0 : i32
    %c0_i32_0 = arith.constant 0 : i32
    %c0_i32_1 = arith.constant 0 : i32
    return %arg1, %c0_i32, %c0_i32_0 : i32, i32, i32
  }
  func.func @transform_16(%arg0: i32, %arg1: i32) -> (i32, i32, i32) {
    %c0_i32 = arith.constant 0 : i32
    %c0_i32_0 = arith.constant 0 : i32
    %c0_i32_1 = arith.constant 0 : i32
    return %arg1, %c0_i32, %c0_i32_0 : i32, i32, i32
  }
  func.func @transform_17(%arg0: i32, %arg1: i32) -> (i32, i32, i32) {
    %c0_i32 = arith.constant 0 : i32
    %c0_i32_0 = arith.constant 0 : i32
    %c0_i32_1 = arith.constant 0 : i32
    return %arg1, %c0_i32, %c0_i32_0 : i32, i32, i32
  }
  func.func @transform_18(%arg0: i32, %arg1: i32) -> (i32, i32, i32) {
    %c0_i32 = arith.constant 0 : i32
    %c0_i32_0 = arith.constant 0 : i32
    %c0_i32_1 = arith.constant 0 : i32
    return %arg1, %c0_i32, %c0_i32_0 : i32, i32, i32
  }
  func.func @transform_19(%arg0: i32, %arg1: i32) -> (i32, i32, i32) {
    %c0_i32 = arith.constant 0 : i32
    %c0_i32_0 = arith.constant 0 : i32
    %c0_i32_1 = arith.constant 0 : i32
    return %arg1, %c0_i32, %c0_i32_0 : i32, i32, i32
  }
  func.func @transform_20(%arg0: i32, %arg1: i32) -> (i32, i32) {
    %c0_i32 = arith.constant 0 : i32
    %c0_i32_0 = arith.constant 0 : i32
    %c0_i32_1 = arith.constant 0 : i32
    return %c0_i32, %c0_i32_0 : i32, i32
  }
  func.func @transform_21(%arg0: i32, %arg1: i32) -> (i32, i32) {
    %c0_i32 = arith.constant 0 : i32
    %c0_i32_0 = arith.constant 0 : i32
    %c0_i32_1 = arith.constant 0 : i32
    return %c0_i32, %c0_i32_0 : i32, i32
  }
  func.func @transform_22(%arg0: i32, %arg1: i32) -> (i32, i32, i32) {
    %c0_i32 = arith.constant 0 : i32
    %c0_i32_0 = arith.constant 0 : i32
    %c0_i32_1 = arith.constant 0 : i32
    return %arg0, %c0_i32, %c0_i32_0 : i32, i32, i32
  }
}

</mosaic_0001>

<bundles_post_ra>
// kernel: tpu_custom_call.1
= control target key start
LH: loop header
LB: loop body
LE: loop exit
PB: predicated region body
PF: predicated region fallthrough
CT: control target
= control target key end

     0   :  { %s4979_s0 = inlined_call_operand.hbm [shape: f32[2,8,32], index: 0, kind: input, shape index: {}]   ;;  %s4980_s1 = inlined_call_operand.hbm [shape: bf16[2,16,32], index: 1, kind: input, shape index: {}]   ;;  %s4981_s2 = inlined_call_operand.hbm [shape: bf16[8,8], index: 2, kind: input, shape index: {}]   ;;  %s4982_s3 = inlined_call_operand.hbm [shape: bf16[8,16], index: 3, kind: input, shape index: {}]   ;;  %s4983_s4 = inlined_call_operand.vmem [shape: f32[2,3,32], index: 4, kind: input, shape index: {}]   ;;  %s4984_s5 = inlined_call_operand.vmem [shape: f32[2,3,32], index: 5, kind: input, shape index: {}]   ;;  %s4985_s6 = inlined_call_operand.vmem [shape: bf16[2,32,96], index: 6, kind: input, shape index: {}]   ;;  %s4986_s7 = inlined_call_operand.hbm [shape: f32[2,1,96], index: 7, kind: input, shape index: {}]   ;;  %s4987_s8 = inlined_call_operand.vmem [shape: bf16[2,32,32], index: 8, kind: input, shape index: {}]   ;;  %s4988_s9 = inlined_call_operand.hbm [shape: f32[2,1,32], index: 9, kind: input, shape index: {}]   ;;  %s4989_s10 = inlined_call_operand.vmem [shape: bf16[2,32,32], index: 10, kind: input, shape index: {}]   ;;  %s4990_s11 = inlined_call_operand.vmem [shape: f32[2,1,32], index: 11, kind: input, shape index: {}]   ;;  %s4991_s12 = inlined_call_operand.vmem [shape: bf16[2,32,64], index: 12, kind: input, shape index: {}]   ;;  %s4992_s13 = inlined_call_operand.vmem [shape: f32[2,1,64], index: 13, kind: input, shape index: {}]   ;;  %s4993_s14 = inlined_call_operand.hbm [shape: bf16[2,32,32], index: 14, kind: input, shape index: {}]   ;;  %s4994_s15 = inlined_call_operand.vmem [shape: f32[2,1,32], index: 15, kind: input, shape index: {}]   ;;  %s4995_s16 = inlined_call_operand.hbm [shape: bf16[2,32,64], index: 16, kind: input, shape index: {}]   ;;  %s4996_s17 = inlined_call_operand.vmem [shape: f32[2,1,64], index: 17, kind: input, shape index: {}]   ;;  %s4997_s18 = inlined_call_operand.vmem [shape: bf16[2,64,32], index: 18, kind: input, shape index: {}]   ;;  %s4998_s19 = inlined_call_operand.vmem [shape: f32[2,1,32], index: 19, kind: input, shape index: {}]   ;;  %s4999_s20 = inlined_call_operand.vmem [shape: f32[1,32], index: 20, kind: input, shape index: {}]   ;;  %s5000_s21 = inlined_call_operand.vmem [shape: f32[1,32], index: 21, kind: input, shape index: {}]   ;;  %s5001_s22 = inlined_call_operand.hbm [shape: f32[2,8,32], index: 22, kind: output, shape index: {}]  }
   0x1   :  { %5050 = sst [smem:[#allocation44_spill]] %s4979_s0 }
   0x2   :  { %5051 = sst [smem:[#allocation45_spill]] %s4980_s1 }
   0x3   :  { %5052 = sst [smem:[#allocation46_spill]] %s4981_s2 }
   0x4   :  { %5053 = sst [smem:[#allocation47_spill]] %s4982_s3 }
   0x5   :  { %5054 = sst [smem:[#allocation48_spill]] %s4983_s4 }
   0x6   :  { %5055 = sst [smem:[#allocation49_spill]] %s4984_s5 }
   0x7   :  { %5056 = sst [smem:[#allocation50_spill]] %s4985_s6 }
   0x8   :  { %5057 = sst [smem:[#allocation51_spill]] %s4986_s7 }
   0x9   :  { %5058 = sst [smem:[#allocation52_spill]] %s4987_s8 }
   0xa   :  { %5059 = sst [smem:[#allocation53_spill]] %s4988_s9 }
   0xb   :  { %5060 = sst [smem:[#allocation54_spill]] %s4989_s10 }
   0xc   :  { %5061 = sst [smem:[#allocation55_spill]] %s4990_s11 }
   0xd   :  { %5062 = sst [smem:[#allocation56_spill]] %s4991_s12 }
   0xe   :  { %5063 = sst [smem:[#allocation57_spill]] %s4992_s13 }
   0xf   :  { %5064 = sst [smem:[#allocation58_spill]] %s4993_s14 }
  0x10   :  { %5065 = sst [smem:[#allocation59_spill]] %s4994_s15 }
  0x11   :  { %5066 = sst [smem:[#allocation60_spill]] %s4995_s16 }
  0x12   :  { %5067 = sst [smem:[#allocation61_spill]] %s4996_s17 }
  0x13   :  { %5068 = sst [smem:[#allocation62_spill]] %s4997_s18 }
  0x14   :  { %5069 = sst [smem:[#allocation63_spill]] %s4998_s19 }
  0x15   :  { %5070 = sst [smem:[#allocation64_spill]] %s4999_s20 }
  0x16   :  { %5071 = sst [smem:[#allocation65_spill]] %s5000_s21 }
  0x17   :  { %5072 = sst [smem:[#allocation66_spill]] %s5001_s22 }
  0x18   :  { %27 = vsyncpa [#allocation4], 0 }
  0x19   :  { %29 = vsyncpa [#allocation4 + $0x1], 0 }
  0x1a   :  { %30 = vsyncpa [#allocation7], 0 }
  0x1b   :  { %32 = vsyncpa [#allocation7 + $0x1], 0 }
  0x1c   :  { %33 = vsyncpa [#allocation10], 0 }
  0x1d   :  { %34 = vsyncpa [#allocation5], 0 }
  0x1e   :  { %36 = vsyncpa [#allocation5 + $0x1], 0  ;;  %s4101_s3 = smov 0   ;;  %s4103_s28 = smov 0  }
  0x1f   :  { %s4105_s29 = smov 0   ;;  %s4107_s30 = smov 0  }
  0x20   :  { %s4109_s4 = smov 0   ;;  %s4111_s0 = smov 0  }
  0x21   :  { %s4113_s23 = smov 0   ;;  %s4115_s1 = smov 0  }
  0x22   :  { %s4117_s5 = smov 0   ;;  %s4119_s24 = smov 0  }
  0x23   :  { %s4121_s6 = smov 0  }
  0x24 LB: > { %5073 = sst [smem:[#allocation25_spill]] %s3921_s28  ;;  %s4155_s25 = sadd.s32 4294967295, %s3957_s6   ;;  %s3957_s6 = sphi %s4121_s6, %s42_s6   ;;  %s3953_s24 = sphi %s4119_s24, %s5191_s24   ;;  %s3949_s5 = sphi %s4117_s5, %s5190_s5   ;;  %s3945_s1 = sphi %s4115_s1, %s5189_s1   ;;  %s3941_s23 = sphi %s4113_s23, %s5188_s23   ;;  %s3937_s0 = sphi %s4111_s0, %s5187_s0   ;;  %s3933_s4 = sphi %s4109_s4, %s5186_s4   ;;  %s3929_s30 = sphi %s4107_s30, %s5185_s30   ;;  %s3925_s29 = sphi %s4105_s29, %s5184_s29   ;;  %s3921_s28 = sphi %s4103_s28, %s5183_s28   ;;  %s3917_s3 = sphi %s4101_s3, %s5182_s3  }
  0x25   : > { %5074 = sst [smem:[#allocation26_spill]] %s3925_s29  ;;  %p246_p0 = scmp.ne.s32.totalorder %s3921_s28, %s3917_s3 }
  0x26   : > { %5075 = sst [smem:[#allocation27_spill]] %s3929_s30  ;;  %p5007_p1 = scmp.eq.s32.totalorder %s4155_s25, 0 }
  0x27   : > { %5076 = sst [smem:[#allocation28_spill]] %s3933_s4  ;;  %p3022_p3 = scmp.ge.s32.totalorder %s3957_s6, 1 }
  0x28   : > { %5077 = sst [smem:[#allocation29_spill]] %s3937_s0  ;;  %p637_p4 = scmp.lt.s32.totalorder %s3957_s6, 5 }
  0x29   : > { %5078 = sst [smem:[#allocation30_spill]] %s3941_s23  ;;  %p4164_p5 = por %p246_p0, %p5007_p1 }
  0x2a   : > { %5079 = sst [smem:[#allocation31_spill]] %s3945_s1  ;;  %p4168_p6 = pnand %p3022_p3, %p637_p4 }
  0x2b   : > { %5080 = sst [smem:[#allocation32_spill]] %s3949_s5  ;;  %s3959_s27 = smov [#allocation8]  }
  0x2c   : > { %5081 = sst [smem:[#allocation33_spill]] %s3953_s24  ;;  %s650_s22 = sshll.u32 %s3959_s27, 4  ;;  %s651_s22 = int_to_ptr.vmem [resolvable:$true] %s650_s22 }
  0x2d   : > { %5082 = sst [smem:[#allocation34_spill]] %s3957_s6  ;;  %p3362_p7 = pneg %p4168_p6 }
  0x2e   : > { %s5083_s26 = scalar_select %p4164_p5, 1, 0 }
  0x2f   : > { %s5085_s2 = scalar_select %p4168_p6, 1, 0 }
  0x30   : > { %5084 = sst [smem:[#allocation35_spill]] %s5083_s26  ;;  %p4176_p8 = pnand %p3362_p7, %p5007_p1 }
  0x31   : > { %s5087_s20 = sld [smem:[#allocation46_spill]] }
  0x32   : > { %s5086_s3 = scalar_select %p4176_p8, 1, 0 }
  0x33   : > { %p5010_p10 = pneg %p4176_p8 }
  0x37   : > { %s3571_s18 = scalar_lea.hbm %s5087_s20, 64 }
  0x38   : > { %p3572_p9 = scmp.ne.s32.totalorder %s5087_s20, %s3571_s18  ;;  %p3578_p13 = scmp.lt.u32.totalorder %s3571_s18, %s5087_s20 }
  0x3a   : > { %p3574_p11 = pnand %p5010_p10, %p3572_p9 }
  0x3c   : > { %p3575_p12 = pneg %p3574_p11 }
  0x3e   : > { %p3580_p0 = pnand %p3578_p13, %p3575_p12 }
  0x40   : > { %3583 = shalt.err (!%p3580_p0)
}
  0x41   : > { %s3584_s21 = scalar_lea.vmem %s651_s22, 64  ;;  %p3592_p1 = scmp.lt.s32.totalorder %s651_s22, %s651_s22 }
  0x42   : > { %p3585_p3 = scmp.ne.s32.totalorder %s651_s22, %s3584_s21  ;;  %p3593_p2 = scmp.lt.s32.totalorder %s3584_s21, %s3584_s21 }
  0x44   : > { %p3587_p4 = pnand %p3585_p3, %p5010_p10  ;;  %p3594_p5 = por %p3593_p2, %p3592_p1 }
  0x46   : > { %p3588_p7 = pneg %p3587_p4 }
  0x48   : > { %p3595_p6 = pnand %p3594_p5, %p3588_p7 }
  0x4a   : > { %3598 = shalt.err (!%p3595_p6)
}
  0x4b   : > { %3365 = dma.hbm_to_vmem [thread:$0]  (!%p4176_p8), %s5087_s20, 64, %s651_s22, [#allocation7]  }
  0x4c   : > { %s3021_s15 = sadd.s32 4294967294, %s3957_s6   ;;  %p68_p1 = scmp.ne.s32.totalorder %s3937_s0, %s3933_s4 }
  0x4d   : > { %p69_p2 = scmp.eq.s32.totalorder %s3957_s6, 0  ;;  %p74_p5 = scmp.ne.s32.totalorder %s3933_s4, %s3929_s30 }
  0x4e   : > { %p240_p6 = scmp.ne.s32.totalorder %s3925_s29, %s3921_s28  ;;  %p5088_p9 = scmp.eq.s32.totalorder %s4155_s25, 3 }
  0x4f   : > { %p70_p12 = por %p69_p2, %p68_p1  ;;  %p5091_p13 = scmp.eq.s32.totalorder %s4155_s25, 0 }
  0x50   : > { %p4214_p11 = por %p5088_p9, %p68_p1  ;;  %p4224_p3 = por %p240_p6, %p69_p2 }
  0x51   : > { %p4220_p0 = por %p5091_p13, %p74_p5  ;;  %p630_p4 = scmp.eq.s32.totalorder %s3021_s15, 3 }
  0x52   : > { %s5089_s27 = scalar_select %p4214_p11, 1, 0 }
  0x53   : > { %s5092_s22 = scalar_select %p4220_p0, 1, 0 }
  0x54   : > { %5090 = sst [smem:[#allocation36_spill]] %s5089_s27  ;;  %p5018_p7 = scmp.lt.s32.totalorder %s3957_s6, 4 }
  0x55   : > { %p4230_p10 = por %p630_p4, %p74_p5  ;;  %s680_s1 = sand.u32 1, %s3937_s0  }
  0x56   : > { %s5016_s18 = sshll.u32 %s3953_s24, 7  ;;  %s4236_s20 = sshll.u32 %s680_s1, 3 }
  0x57   : > { %s5094_s19 = scalar_select %p4230_p10, 1, 0 }
  0x58   : > { %s5096_s13 = sld [smem:[#allocation44_spill]]  ;;  %p4247_p1 = pnand %p5018_p7, %p70_p12 }
  0x59   : > { %5095 = sst [smem:[#allocation37_spill]] %s5094_s19  ;;  %s682_s1 = scalar_lea.vmem [#allocation3], %s4236_s20 }
  0x5a   : > { %s689_s17 = sshll.u32 %s682_s1, 4  ;;  %s5098_s19 = sand.u32 1, %s3957_s6   ;;  %s4252_s17 = int_to_ptr.vmem [resolvable:$true] %s689_s17 }
  0x5b   : > { %s4256_s30 = scalar_lea.sflag [#allocation4], %s5098_s19  ;;  %p3601_p5 = pneg %p4247_p1 }
  0x5e   : > { %s4243_s12 = scalar_lea.hbm %s5096_s13, %s5016_s18  ;;  %s3604_s10 = scalar_lea.hbm %s5096_s13, 256 }
  0x5f   : > { %s3599_s27 = scalar_lea.hbm %s4243_s12, 128  ;;  %p3605_p12 = scmp.lt.u32.totalorder %s4243_s12, %s5096_s13 }
  0x60   : > { %p3600_p2 = scmp.ne.s32.totalorder %s4243_s12, %s3599_s27  ;;  %p3606_p13 = scmp.lt.u32.totalorder %s3604_s10, %s3599_s27 }
  0x61   : > { %p3608_p7 = scmp.lt.u32.totalorder %s3599_s27, %s4243_s12 }
  0x62   : > { %p3602_p6 = pnand %p3601_p5, %p3600_p2  ;;  %p3607_p4 = por %p3606_p13, %p3605_p12 }
  0x64   : > { %p3603_p9 = pneg %p3602_p6  ;;  %p3609_p10 = por %p3608_p7, %p3607_p4 }
  0x66   : > { %p3610_p11 = pnand %p3609_p10, %p3603_p9 }
  0x68   : > { %3613 = shalt.err (!%p3610_p11)
}
  0x69   : > { %s3614_s19 = scalar_lea.vmem %s4252_s17, 128  ;;  %s3960_s11 = smov [#allocation3]  }
  0x6a   : > { %p3615_p2 = scmp.ne.s32.totalorder %s4252_s17, %s3614_s19  ;;  %s3619_s18 = sshll.u32 %s3960_s11, 4  ;;  %s3620_s18 = int_to_ptr.vmem [resolvable:$false] %s3619_s18 }
  0x6b   : > { %s3621_s8 = scalar_lea.vmem %s3620_s18, 256  ;;  %p3622_p8 = scmp.lt.s32.totalorder %s4252_s17, %s3620_s18 }
  0x6c   : > { %p3617_p6 = pnand %p3615_p2, %p3601_p5  ;;  %p3623_p12 = scmp.lt.s32.totalorder %s3621_s8, %s3614_s19 }
  0x6e   : > { %p3618_p0 = pneg %p3617_p6  ;;  %p3624_p13 = por %p3623_p12, %p3622_p8 }
  0x70   : > { %p3625_p7 = pnand %p3624_p13, %p3618_p0 }
  0x72   : > { %3628 = shalt.err (!%p3625_p7)
}
  0x73   : > { %3372 = dma.hbm_to_vmem [thread:$0]  (!%p4247_p1), %s4243_s12, 128, %s4252_s17, %s4256_s30  }
  0x74   : > { %s5099_s10 = sshll.u32 %s3953_s24, 7  ;;  %s5100_s27 = sld [smem:[#allocation45_spill]] }
  0x75   : > { %s700_s11 = scalar_lea.vmem [#allocation6], %s4236_s20  ;;  %p5101_p8 = scmp.lt.s32.totalorder %s3957_s6, 4 }
  0x76   : > { %s707_s18 = sshll.u32 %s700_s11, 4  ;;  %s5103_s12 = sand.u32 1, %s3957_s6   ;;  %s4300_s18 = int_to_ptr.vmem [resolvable:$true] %s707_s18 }
  0x77   : > { %p4296_p10 = pnand %p5101_p8, %p4224_p3  ;;  %s4304_s17 = scalar_lea.sflag [#allocation7], %s5103_s12 }
  0x79   : > { %s5102_s8 = scalar_select %p4296_p10, 1, 0 }
  0x7a   : > { %s4289_s19 = scalar_lea.hbm %s5100_s27, %s5099_s10  ;;  %s3634_s21 = scalar_lea.hbm %s5100_s27, 256 }
  0x7b   : > { %s3629_s23 = scalar_lea.hbm %s4289_s19, 128  ;;  %p3635_p3 = scmp.lt.u32.totalorder %s4289_s19, %s5100_s27 }
  0x7c   : > { %p3630_p11 = scmp.ne.s32.totalorder %s4289_s19, %s3629_s23  ;;  %p3636_p4 = scmp.lt.u32.totalorder %s3634_s21, %s3629_s23 }
  0x7d   : > { %p3638_p6 = scmp.lt.u32.totalorder %s3629_s23, %s4289_s19 }
  0x7e   : > { %p3632_p0 = pnand %p3630_p11, %p3601_p5  ;;  %p3637_p2 = por %p3636_p4, %p3635_p3 }
  0x80   : > { %p3633_p9 = pneg %p3632_p0  ;;  %p3639_p12 = por %p3638_p6, %p3637_p2 }
  0x82   : > { %p3640_p13 = pnand %p3639_p12, %p3633_p9 }
  0x84   : > { %3643 = shalt.err (!%p3640_p13)
}
  0x85   : > { %s3644_s12 = scalar_lea.vmem %s4300_s18, 128  ;;  %s3961_s10 = smov [#allocation6]  }
  0x86   : > { %p3645_p7 = scmp.ne.s32.totalorder %s4300_s18, %s3644_s12  ;;  %s3649_s20 = sshll.u32 %s3961_s10, 4  ;;  %s3650_s20 = int_to_ptr.vmem [resolvable:$false] %s3649_s20 }
  0x87   : > { %s3651_s1 = scalar_lea.vmem %s3650_s20, 256  ;;  %p3652_p0 = scmp.lt.s32.totalorder %s4300_s18, %s3650_s20 }
  0x88   : > { %p3647_p8 = pnand %p3645_p7, %p3601_p5  ;;  %p3653_p3 = scmp.lt.s32.totalorder %s3651_s1, %s3644_s12 }
  0x8a   : > { %p3648_p11 = pneg %p3647_p8  ;;  %p3654_p4 = por %p3653_p3, %p3652_p0 }
  0x8c   : > { %p3655_p2 = pnand %p3654_p4, %p3648_p11 }
  0x8e   : > { %3658 = shalt.err (!%p3655_p2)
}
  0x8f   : > { %s5027_s23 = smov 64   ;;  %s5029_s21 = smov 4  }
  0x90   : > { %3375 = dma.hbm_to_vmem [thread:$0]  (!%p4247_p1), %s4289_s19, 128, %s4300_s18, %s4304_s17, %s5027_s23, %s5027_s23, %s5029_s21  }
  0x91   : > { %s4335_s12 = sand.u32 1, %s3925_s29   ;;  %s51_s10 = sadd.s32 1, %s3949_s5 }
  0x92   : > { %p52_p5 = scmp.ge.s32.totalorder %s51_s10, 2  ;;  %s5031_s20 = sshll.u32 %s3949_s5, 4 }
  0x93   : > { %s5104_s7 = sld [smem:[#allocation51_spill]]  ;;  %s742_s15 = scalar_lea.vmem [#allocation11], %s4335_s12 }
  0x94   : > { %s749_s6 = sshll.u32 %s742_s15, 4  ;;  %s5193_s10 = smov (%p52_p5, %s51_s10), 0  ;;  %s4356_s6 = int_to_ptr.vmem [resolvable:$true] %s749_s6 }
  0x95   : > { %5105 = sst [smem:[#allocation38_spill]] %s5193_s10  ;;  %s5106_s19 = sadd.s32 1, %s3953_s24 }
  0x96   : > { %s5195_s19 = smov (!%p52_p5, %s5106_s19), %s3953_s24  ;;  %s230_s18 = ssub.s32 %s3949_s5, %s5193_s10 }
  0x97   : > { %p4359_p9 = scmp.eq.s32.totalorder %s230_s18, 0  ;;  %p4367_p12 = pneg %p4296_p10 }
  0x99   : > { %s4344_s27 = scalar_lea.hbm %s5104_s7, %s5031_s20  ;;  %s3664_s20 = scalar_lea.hbm %s5104_s7, 32 }
  0x9a   : > { %s5107_s13 = scalar_select %p4359_p9, 1, 0 }
  0x9b   : > { %s3659_s1 = scalar_lea.hbm %s4344_s27, 16  ;;  %p3665_p8 = scmp.lt.u32.totalorder %s4344_s27, %s5104_s7 }
  0x9c   : > { %p3660_p6 = scmp.ne.s32.totalorder %s4344_s27, %s3659_s1  ;;  %p3666_p11 = scmp.lt.u32.totalorder %s3664_s20, %s3659_s1 }
  0x9d   : > { %s5108_s15 = scalar_select %p4367_p12, 1, 0 }
  0x9e   : > { %p3662_p13 = pnand %p4367_p12, %p3660_p6  ;;  %p3667_p0 = por %p3666_p11, %p3665_p8 }
  0x9f   : > { %p3668_p3 = scmp.lt.u32.totalorder %s3659_s1, %s4344_s27 }
  0xa0   : > { %p3663_p7 = pneg %p3662_p13 }
  0xa1   : > { %p3669_p4 = por %p3668_p3, %p3667_p0 }
  0xa3   : > { %p3670_p2 = pnand %p3669_p4, %p3663_p7 }
  0xa5   : > { %3673 = shalt.err (!%p3670_p2)
}
  0xa6   : > { %s3674_s10 = scalar_lea.vmem %s4356_s6, 16  ;;  %s3964_s23 = smov [#allocation11]  }
  0xa7   : > { %p3675_p5 = scmp.ne.s32.totalorder %s4356_s6, %s3674_s10  ;;  %s3679_s21 = sshll.u32 %s3964_s23, 4  ;;  %s3680_s21 = int_to_ptr.vmem [resolvable:$false] %s3679_s21 }
  0xa8   : > { %s3681_s11 = scalar_lea.vmem %s3680_s21, 32  ;;  %p3682_p1 = scmp.lt.s32.totalorder %s4356_s6, %s3680_s21 }
  0xa9   : > { %p3677_p6 = pnand %p3675_p5, %p4367_p12  ;;  %p3683_p9 = scmp.lt.s32.totalorder %s3681_s11, %s3674_s10 }
  0xab   : > { %p3678_p13 = pneg %p3677_p6  ;;  %p3684_p8 = por %p3683_p9, %p3682_p1 }
  0xad   : > { %p3685_p11 = pnand %p3684_p8, %p3678_p13 }
  0xaf   : > { %3688 = shalt.err (!%p3685_p11)
}
  0xb0   : > { %3378 = dma.hbm_to_vmem [thread:$0]  (!%p4296_p10), %s4344_s27, 16, %s4356_s6, %s4256_s30  }
  0xb1   : > { %p5109_p1 = scmp.ge.s32.totalorder %s5195_s19, 2  ;;  %s5111_s10 = sadd.s32 1, %s3925_s29 }
  0xb2   : > { %p5112_p9 = scmp.ne.s32.totalorder %s5107_s13, 0  ;;  %s5114_s23 = sadd.s32 1, %s3937_s0 }
  0xb3   : > { %s5197_s19 = smov (%p5109_p1, %s5195_s19), 0  ;;  %s5116_s11 = sshll.u32 %s3949_s5, 4 }
  0xb4   : > { %5110 = sst [smem:[#allocation39_spill]] %s5197_s19  ;;  %s58_s1 = ssub.s32 %s3953_s24, %s5197_s19 }
  0xb5   : > { %s4401_s20 = scalar_select %p5112_p9, %s3925_s29, %s5111_s10  }
  0xb6   : > { %p59_p7 = scmp.eq.s32.totalorder %s58_s1, 0  ;;  %s5117_s9 = sld [smem:[#allocation53_spill]] }
  0xb7   : > { %5113 = sst [smem:[#allocation40_spill]] %s4401_s20  ;;  %s767_s6 = scalar_lea.vmem [#allocation12], %s4335_s12 }
  0xb8   : > { %s4409_s21 = scalar_select %p59_p7, %s3937_s0, %s5114_s23  }
  0xb9   : > { %s774_s27 = sshll.u32 %s767_s6, 4  ;;  %s775_s27 = int_to_ptr.vmem [resolvable:$true] %s774_s27 }
  0xba   : > { %5115 = sst [smem:[#allocation41_spill]] %s4409_s21 }
  0xbc   : > { %s4416_s28 = scalar_lea.hbm %s5117_s9, %s5116_s11  ;;  %s3694_s23 = scalar_lea.hbm %s5117_s9, 32 }
  0xbd   : > { %s3689_s13 = scalar_lea.hbm %s4416_s28, 16  ;;  %p3695_p2 = scmp.lt.u32.totalorder %s4416_s28, %s5117_s9 }
  0xbe   : > { %p3690_p0 = scmp.ne.s32.totalorder %s4416_s28, %s3689_s13  ;;  %p3696_p5 = scmp.lt.u32.totalorder %s3694_s23, %s3689_s13 }
  0xbf   : > { %p3698_p13 = scmp.lt.u32.totalorder %s3689_s13, %s4416_s28 }
  0xc0   : > { %p3692_p3 = pnand %p3690_p0, %p4367_p12  ;;  %p3697_p6 = por %p3696_p5, %p3695_p2 }
  0xc2   : > { %p3693_p4 = pneg %p3692_p3  ;;  %p3699_p8 = por %p3698_p13, %p3697_p6 }
  0xc4   : > { %p3700_p11 = pnand %p3699_p8, %p3693_p4 }
  0xc6   : > { %3703 = shalt.err (!%p3700_p11)
}
  0xc7   : > { %s3704_s26 = scalar_lea.vmem %s775_s27, 16  ;;  %s3965_s11 = smov [#allocation12]  }
  0xc8   : > { %p3705_p1 = scmp.ne.s32.totalorder %s775_s27, %s3704_s26  ;;  %s3709_s6 = sshll.u32 %s3965_s11, 4  ;;  %s3710_s6 = int_to_ptr.vmem [resolvable:$false] %s3709_s6 }
  0xc9   : > { %s3711_s10 = scalar_lea.vmem %s3710_s6, 32  ;;  %p3712_p0 = scmp.lt.s32.totalorder %s775_s27, %s3710_s6 }
  0xca   : > { %p3707_p9 = pnand %p3705_p1, %p4367_p12  ;;  %p3713_p3 = scmp.lt.s32.totalorder %s3711_s10, %s3704_s26 }
  0xcc   : > { %p3708_p7 = pneg %p3707_p9  ;;  %p3714_p10 = por %p3713_p3, %p3712_p0 }
  0xce   : > { %p3715_p2 = pnand %p3714_p10, %p3708_p7 }
  0xd0   : > { %3718 = shalt.err (!%p3715_p2)
}
  0xd1   : > { %p5118_p5 = scmp.ne.s32.totalorder %s5102_s8, 0  ;;  %s3966_s18 = smov [#allocation9]  }
  0xd2   : > { %s661_s13 = sshll.u32 %s3966_s18, 4  ;;  %s3122_s1 = sshll.u32 %s3949_s5, 8  ;;  %s662_s13 = int_to_ptr.vmem [resolvable:$true] %s661_s13 }
  0xd3   : > { %3381 = dma.hbm_to_vmem [thread:$0]  (!%p5118_p5), %s4416_s28, 16, %s775_s27, %s4304_s17  }
  0xd4   : > { %s5119_s14 = sld [smem:[#allocation58_spill]]  ;;  %s5120_s10 = sld [smem:[#allocation47_spill]] }
  0xd5   : > { %p5121_p4 = scmp.ne.s32.totalorder %s5086_s3, 0 }
  0xd7   : > { %p5122_p6 = pneg %p5121_p4 }
  0xda   : > { %s4441_s11 = scalar_lea.hbm %s5119_s14, %s3122_s1  ;;  %s3719_s9 = scalar_lea.hbm %s5120_s10, 64 }
  0xdb   : > { %p3720_p10 = scmp.ne.s32.totalorder %s5120_s10, %s3719_s9  ;;  %p3726_p11 = scmp.lt.u32.totalorder %s3719_s9, %s5120_s10 }
  0xdd   : > { %p3722_p13 = pnand %p3720_p10, %p5122_p6 }
  0xdf   : > { %p3723_p8 = pneg %p3722_p13 }
  0xe1   : > { %p3728_p1 = pnand %p3726_p11, %p3723_p8 }
  0xe3   : > { %3731 = shalt.err (!%p3728_p1)
}
  0xe4   : > { %s3732_s18 = scalar_lea.vmem %s662_s13, 64  ;;  %p5123_p7 = pmov %p5122_p6 }
  0xe5   : > { %p3733_p9 = scmp.ne.s32.totalorder %s662_s13, %s3732_s18  ;;  %p3740_p2 = scmp.lt.s32.totalorder %s662_s13, %s662_s13 }
  0xe6   : > { %p3741_p5 = scmp.lt.s32.totalorder %s3732_s18, %s3732_s18 }
  0xe7   : > { %p3735_p0 = pnand %p3733_p9, %p5123_p7 }
  0xe8   : > { %p3742_p12 = por %p3741_p5, %p3740_p2 }
  0xe9   : > { %p3736_p3 = pneg %p3735_p0 }
  0xeb   : > { %p3743_p6 = pnand %p3742_p12, %p3736_p3 }
  0xed   : > { %3746 = shalt.err (!%p3743_p6)
}
  0xee   : > { %3368 = dma.hbm_to_vmem [thread:$0]  (!%p5121_p4), %s5120_s10, 64, %s662_s13, [#allocation10]  }
  0xef   : > { %s5124_s9 = sshll.u32 %s4335_s12, 4  ;;  %s5125_s16 = sld [smem:[#allocation60_spill]] }
  0xf0   : > { %s813_s23 = scalar_lea.vmem [#allocation13], %s5124_s9  ;;  %s5126_s3 = smov %s5124_s9 }
  0xf1   : > { %s820_s7 = sshll.u32 %s813_s23, 4  ;;  %s4474_s27 = scalar_lea.vmem [#allocation14], %s5126_s3  ;;  %s4470_s7 = int_to_ptr.vmem [resolvable:$true] %s820_s7 }
  0xf2   : > { %s847_s18 = sshll.u32 %s4474_s27, 4  ;;  %s3747_s24 = scalar_lea.hbm %s4441_s11, 256  ;;  %s4504_s18 = int_to_ptr.vmem [resolvable:$true] %s847_s18 }
  0xf3   : > { %p3748_p12 = scmp.ne.s32.totalorder %s4441_s11, %s3747_s24  ;;  %p5127_p5 = scmp.ne.s32.totalorder %s5108_s15, 0 }
  0xf4   : > { %s3752_s9 = scalar_lea.hbm %s5119_s14, 512  ;;  %p3753_p13 = scmp.lt.u32.totalorder %s4441_s11, %s5119_s14 }
  0xf5   : > { %s4468_s28 = scalar_lea.hbm %s5125_s16, %s3122_s1  ;;  %p3750_p10 = pnand %p3748_p12, %p5127_p5 }
  0xf6   : > { %p3754_p8 = scmp.lt.u32.totalorder %s3752_s9, %s3747_s24  ;;  %p3756_p1 = scmp.lt.u32.totalorder %s3747_s24, %s4441_s11 }
  0xf7   : > { %p3751_p4 = pneg %p3750_p10 }
  0xf8   : > { %p3755_p11 = por %p3754_p8, %p3753_p13 }
  0xfa   : > { %p3757_p9 = por %p3756_p1, %p3755_p11 }
  0xfc   : > { %p3758_p7 = pnand %p3757_p9, %p3751_p4 }
  0xfe   : > { %3761 = shalt.err (!%p3758_p7)
}
  0xff   : > { %s3762_s12 = scalar_lea.vmem %s4470_s7, 256  ;;  %s3967_s1 = smov [#allocation13]  }
 0x100   : > { %p3763_p0 = scmp.ne.s32.totalorder %s4470_s7, %s3762_s12  ;;  %s3767_s6 = sshll.u32 %s3967_s1, 4  ;;  %s3768_s6 = int_to_ptr.vmem [resolvable:$false] %s3767_s6 }
 0x101   : > { %s3769_s3 = scalar_lea.vmem %s3768_s6, 512  ;;  %p3770_p6 = scmp.lt.s32.totalorder %s4470_s7, %s3768_s6 }
 0x102   : > { %p3765_p3 = pnand %p3763_p0, %p5127_p5  ;;  %p3771_p12 = scmp.lt.s32.totalorder %s3769_s3, %s3762_s12 }
 0x104   : > { %p3766_p2 = pneg %p3765_p3  ;;  %p3772_p10 = por %p3771_p12, %p3770_p6 }
 0x106   : > { %p3773_p13 = pnand %p3772_p10, %p3766_p2 }
 0x108   : > { %3776 = shalt.err (!%p3773_p13)
}
 0x109   : > { %p5128_p4 = scmp.ne.s32.totalorder %s5102_s8, 0  ;;  %s5129_s24 = smov 4  }
 0x10a   : > { %s5130_s13 = smov 64   ;;  %s3777_s19 = scalar_lea.hbm %s4468_s28, 256 }
 0x10b   : > { %3384 = dma.hbm_to_vmem [thread:$0]  (!%p5128_p4), %s4441_s11, 256, %s4470_s7, %s4256_s30, %s5130_s13, %s5130_s13, %s5129_s24  }
 0x10c   : > { %p3778_p8 = scmp.ne.s32.totalorder %s4468_s28, %s3777_s19  ;;  %s3782_s26 = scalar_lea.hbm %s5125_s16, 512 }
 0x10d   : > { %p3783_p9 = scmp.lt.u32.totalorder %s4468_s28, %s5125_s16  ;;  %p3784_p7 = scmp.lt.u32.totalorder %s3782_s26, %s3777_s19 }
 0x10e   : > { %p3780_p11 = pnand %p3778_p8, %p5127_p5  ;;  %p3786_p3 = scmp.lt.u32.totalorder %s3777_s19, %s4468_s28 }
 0x10f   : > { %p3785_p0 = por %p3784_p7, %p3783_p9 }
 0x110   : > { %p3781_p1 = pneg %p3780_p11 }
 0x111   : > { %p3787_p2 = por %p3786_p3, %p3785_p0 }
 0x113   : > { %p3788_p6 = pnand %p3787_p2, %p3781_p1 }
 0x115   : > { %3791 = shalt.err (!%p3788_p6)
}
 0x116   : > { %s3792_s30 = scalar_lea.vmem %s4504_s18, 256  ;;  %s3968_s11 = smov [#allocation14]  }
 0x117   : > { %p3793_p12 = scmp.ne.s32.totalorder %s4504_s18, %s3792_s30  ;;  %s3797_s7 = sshll.u32 %s3968_s11, 4  ;;  %s3798_s7 = int_to_ptr.vmem [resolvable:$false] %s3797_s7 }
 0x118   : > { %s3799_s27 = scalar_lea.vmem %s3798_s7, 512  ;;  %p3800_p8 = scmp.lt.s32.totalorder %s4504_s18, %s3798_s7 }
 0x119   : > { %p3795_p10 = pnand %p3793_p12, %p5127_p5  ;;  %p3801_p11 = scmp.lt.s32.totalorder %s3799_s27, %s3792_s30 }
 0x11b   : > { %p3796_p13 = pneg %p3795_p10  ;;  %p3802_p9 = por %p3801_p11, %p3800_p8 }
 0x11d   : > { %p3803_p7 = pnand %p3802_p9, %p3796_p13 }
 0x11f   : > { %3806 = shalt.err (!%p3803_p7)
}
 0x120   : > { %3387 = dma.hbm_to_vmem [thread:$0]  (!%p5128_p4), %s4468_s28, 256, %s4504_s18, %s4304_s17, %s5130_s13, %s5130_s13, %s5129_s24  }
 0x121   : > { %p5131_p5 = scmp.ne.s32.totalorder %s5085_s2, 0 }
 0x123   : > { %879 = sbr.rel (%p5131_p5) target bundleno = 5088 (0x13e0), region = 108 }
 0x12a   : > { %s881_s15 = sand.u32 1, %s4155_s25   ;;  %s5042_s6 = sand.u32 1, %s3933_s4  }
 0x12b   : > { %s4537_s3 = sshll.u32 %s5042_s6, 3  ;;  %s882_s8 = scalar_lea.sflag [#allocation4], %s881_s15 }
 0x12c   : > { %p5132_p1 = scmp.ne.s32.totalorder %s5092_s22, 0 }
 0x12e   : > { %3880 = dma.done.wait (%p5132_p1), %s882_s8, 128  }
 0x12f   : > { %3882 = vsyncadd (%p5132_p1), %s882_s8, 4294967168  ;;  %s891_s2 = scalar_lea.sflag [#allocation7], %s881_s15 }
 0x130   : > { %3884 = dma.done.wait (%p5132_p1), %s891_s2, 128  }
 0x131   : > { %3886 = vsyncadd (%p5132_p1), %s891_s2, 4294967168  ;;  %p5133_p4 = scmp.eq.s32.totalorder %s4155_s25, 0 }
 0x133   : > { %3888 = dma.done.wait (%p5133_p4), [#allocation7], 64   ;;  %p5134_p0 = pmov %p5133_p4 }
 0x135   : > { %3890 = vsyncadd (%p5134_p0), [#allocation7], 4294967232  ;;  %p5135_p3 = pmov %p5134_p0 }
 0x136   : > { %p5136_p2 = pmov %p5134_p0 }
 0x137   : > { %3892 = dma.done.wait (%p5135_p3), [#allocation10], 64  }
 0x138   : > { %3894 = vsyncadd (%p5136_p2), [#allocation10], 4294967232  ;;  %s5137_s28 = sld [smem:[#allocation25_spill]]  ;;  %s5138_s18 = sld [smem:[#allocation35_spill]] }
 0x13e   : > { %s4558_s24 = sand.u32 1, %s5137_s28   ;;  %p5139_p6 = scmp.ne.s32.totalorder %s5138_s18, 0 }
 0x140   : > { %3896 = dma.done.wait (%p5139_p6), %s882_s8, 16  }
 0x141   : > { %3898 = vsyncadd (%p5139_p6), %s882_s8, 4294967280 }
 0x142   : > { %3900 = dma.done.wait (%p5139_p6), %s891_s2, 16  }
 0x143   : > { %3902 = vsyncadd (%p5139_p6), %s891_s2, 4294967280  ;;  %s3044_s25 = sshll.u32 %s4558_s24, 4 }
 0x144   : > { %s4571_s9 = scalar_lea.vmem [#allocation13], %s3044_s25 }
 0x145   : > { %5140 = sst [smem:[#allocation42_spill]] %s4571_s9 }
 0x146   : > { %3904 = dma.done.wait (%p5139_p6), %s882_s8, 256  }
 0x147   : > { %3906 = vsyncadd (%p5139_p6), %s882_s8, 4294967040  ;;  %s4577_s23 = scalar_lea.vmem [#allocation14], %s3044_s25 }
 0x148   : > { %5141 = sst [smem:[#allocation43_spill]] %s4577_s23 }
 0x149   : > { %3908 = dma.done.wait (%p5139_p6), %s891_s2, 256  }
 0x14a   : > { %3910 = vsyncadd (%p5139_p6), %s891_s2, 4294967040  ;;  %s5142_s26 = sld [smem:[#allocation30_spill]]  ;;  %s5143_s27 = sld [smem:[#allocation48_spill]] }
 0x14b   : > { %s5144_s28 = sld [smem:[#allocation49_spill]]  ;;  %s5145_s17 = sld [smem:[#allocation50_spill]] }
 0x14c   : > { %s5146_s10 = sld [smem:[#allocation52_spill]]  ;;  %s5147_s11 = sld [smem:[#allocation54_spill]] }
 0x14d   : > { %s5149_s0 = sld [smem:[#allocation56_spill]]  ;;  %s5150_s20 = sld [smem:[#allocation57_spill]] }
 0x14e   : > { %s5151_s29 = sld [smem:[#allocation59_spill]]  ;;  %s5153_s8 = sld [smem:[#allocation63_spill]] }
 0x150   : > { %p1068_p12 = scmp.lt.s32.totalorder %s5142_s26, 1  ;;  %p3059_p10 = scmp.ne.s32.totalorder %s5142_s26, 0 }
 0x151   : > { %vm1122_vm0 = vcmask (!%p3059_p10), 261120  }
 0x152   : > { %s4585_s12 = scalar_select %p1068_p12, %s5142_s26, 1 }
 0x154   : > { %s3047_s1 = sshll.u32 %s4585_s12, 2  ;;  %s3124_s30 = sshll.u32 %s4585_s12, 4 }
 0x155   : > { %s4592_s15 = scalar_lea.vmem %s5143_s27, %s3047_s1  ;;  %s4597_s18 = scalar_lea.vmem %s5144_s28, %s3047_s1 }
 0x156   : > { %s4602_s22 = scalar_lea.vmem %s5145_s17, %s3124_s30  ;;  %s4607_s14 = scalar_lea.vmem %s5146_s10, %s3124_s30 }
 0x157   : > { %s4612_s7 = scalar_lea.vmem %s5147_s11, %s3124_s30  ;;  %s4621_s6 = scalar_lea.vmem %s5149_s0, %s3124_s30 }
 0x158   : > { %s1101_s19 = scalar_lea.vmem %s5150_s20, %s4585_s12  ;;  %s1104_s4 = scalar_lea.vmem %s5151_s29, %s4585_s12 }
 0x159   : > { %s5152_s11 = sld [smem:[#allocation61_spill]]  ;;  %s3128_s9 = sshll.u32 %s4585_s12, 5 }
 0x15a   : > { %s1115_s1 = scalar_lea.vmem %s5153_s8, %s4585_s12  ;;  %s5154_s30 = sld [smem:[#allocation62_spill]] }
 0x15b   : > { %s4646_s17 = scalar_lea.vmem [#allocation15], %s4537_s3  ;;  %1120 = sbr.rel (%p3059_p10) target bundleno = 354 (0x162), region = 144 }
 0x15c   : > { %s5155_s29 = scalar_lea.vmem (!%p3059_p10), [#allocation3], %s4537_s3 }
 0x15d   : > { %v1121_v0 = vld [vmem:[%s5155_s29] sm:$0xff] (!%p3059_p10) }
 0x15e   : > { %1123 = vst.msk [vmem:[#allocation2] sm:$0xff] (!%p3059_p10), %vm1122_vm0, %v1121_v0 }
 0x15f   : > { %s1107_s23 = scalar_lea.vmem %s5152_s11, %s4585_s12 }
 0x160   : > { %s4643_s28 = scalar_lea.vmem %s5154_s30, %s3128_s9 }
 0x162 PF: > { %vm1130_vm1 = vcmask 261120   ;;  %v3506_v8 = vld [vmem:[%s4602_s22] sm:$0xff]   ;;  %v3969_v9 = vmov 0.0   ;;  %vm3970_vm2 = vmmov 0   ;;  %v3507_v10 = vld [vmem:[%s4602_s22 + $0x8] sm:$0xff]   ;;  %s5156_s20 = scalar_lea.vmem [#allocation11], %s4558_s24 }
 0x163   : > { %3184 = vmatprep.subr.bf16.mxu1 %v3969_v9  ;;  %3188 = vmatprep.mubr.msk.bf16.mxu1 %vm3970_vm2, %v3969_v9  ;;  %v3060_v20 = vld [vmem:[%s4592_s15] ss:$0 sm:$0xff]  ;;  %s3971_s22 = smov 120   ;;  %s3972_s9 = smov 96   ;;  %vm1240_vm5 = vcmask 64512   ;;  %vm1304_vm6 = vcmask 1043456  }
 0x164   : > { %3185 = vmatpush3.bf16.msra.mxu1 %v3506_v8  ;;  %3198 = vmatprep.subr.bf16.mxu0 %v3969_v9  ;;  %v3061_v22 = vld [vmem:[%s4597_s18] ss:$0 sm:$0xff]  ;;  %s3973_s26 = smov 88   ;;  %s3974_s25 = smov 80   ;;  %v1127_v44 = vld [vmem:[#allocation8] sm:$0xf] }
 0x165   : > { %v4651_v1 = vld [vmem:[#allocation2] sm:$0xff]  ;;  %3186 = vmatprep.subr.bf16.mxu1 %v3969_v9  ;;  %3200 = vmatprep.mubr.msk.bf16.mxu0 %vm3970_vm2, %v3969_v9  ;;  %s3975_s10 = smov 112   ;;  %s3976_s13 = smov 72   ;;  %v1236_v45 = vunpack.c.l.bf16 %v1127_v44  ;;  %vm1691_vm7 = vcmask 130048   ;;  %vm1693_vm8 = vcmask 195584   ;;  %vm2579_vm13 = vcmask 523264  }
 0x166   : > { %v1131_v2 = vsel %vm1130_vm1, %v4651_v1, 0.0  ;;  %v3062_v26 = vld [vmem:[%s5156_s20] ss:$0 sm:$0xff]  ;;  %s3977_s16 = smov 104   ;;  %s3978_s5 = smov 64  }
 0x167   : > { %1132 = vadd.xlane.f32.xlu0 %v1131_v2  ;;  %s3979_s11 = smov 56   ;;  %s3980_s21 = smov 48  }
 0x168   : > { %3187 = vmatpush3.bf16.msra.mxu1 %v3507_v10  ;;  %s3981_s27 = smov 40   ;;  %s3982_s8 = smov 8  }
 0x169   : > { %3192 = vmatprep.subr.bf16.mxu1 %v3969_v9  ;;  %s3983_s2 = smov 16   ;;  %s3984_s0 = smov 24  }
 0x1f4   : > { %v1133_v3 = vpop.xlane.xlu0 %1132 }
 0x1f5   : > { %v1135_v4 = vmul.f32 0.03125, %v1133_v3 }
 0x1f7   : > { %v1136_v5 = vsub.f32 %v4651_v1, %v1135_v4 }
 0x1f9   : > { %v1137_v6 = vmul.f32 %v1136_v5, %v1136_v5 }
 0x1fb   : > { %v1138_v7 = vsel %vm1130_vm1, %v1137_v6, 0.0 }
 0x1fc   : > { %1139 = vadd.xlane.f32.xlu0 %v1138_v7 }
 0x289   : > { %v1140_v11 = vpop.xlane.xlu0 %1139 }
 0x28a   : > { %v1141_v12 = vmul.f32 0.032258064, %v1140_v11 }
 0x28c   : > { %3523 = vrsqrt.f32 %v1141_v12  ;;  %vm1144_vm3 = vcmp.eq.f32.partialorder %v1141_v12, inf  ;;  %v1147_v15 = vand.u32 2147483648, %v1141_v12  ;;  %vm1146_vm4 = vcmp.eq.f32.partialorder %v1141_v12, 0.0 }
 0x296   : > { %v3524_v13 = vpop.eup %3523 }
 0x297   : > { %v1143_v14 = vmul.f32 %v3524_v13, %v1141_v12 }
 0x299   : > { %v1145_v16 = vsel %vm1144_vm3, %v1141_v12, %v1143_v14 }
 0x29a   : > { %v1148_v17 = vsel %vm1146_vm4, %v1147_v15, %v1145_v16 }
 0x29b   : > { %v1149_v18 = vadd.f32 1e-06, %v1148_v17 }
 0x29d   : > { %3525 = vrcp.f32 %v1149_v18 }
 0x2a7   : > { %v3526_v19 = vpop.eup %3525 }
 0x2a8   : > { %v1152_v21 = vmul.f32 %v3526_v19, %v1136_v5 }
 0x2aa   : > { %v1157_v23 = vmul.f32 %v3060_v20, %v1152_v21 }
 0x2ac   : > { %v1162_v24 = vadd.f32 %v3061_v22, %v1157_v23 }
 0x2ae   : > { %v1163_v25 = vpack.c.bf16 %v1162_v24, %v1162_v24 }
 0x2b0   : > { %3189 = vmatmul.mubr.msk.bf16.vlgmr.msra.gmra.mrb[0].mxu1 %vm1130_vm1, %v1163_v25 }
 0x2b1   : > { %3194 = vmatprep.mubr.msk.bf16.mxu1 %vm3970_vm2, %v3969_v9 }
 0x383   : > { %v1224_v27 = vpop.f32.mrb[0].mxu1 }
 0x384   : > { %v1225_v28 = vadd.f32 %v3062_v26, %v1224_v27  ;;  %v3190_v29 = vpop.f32.mrb[1].mxu1 }
 0x385   : > { %v1227_v30 = vpop.f32.mrb[2].mxu1 }
 0x386   : > { %v4674_v31 = vpack.c.bf16 %v1225_v28, %v1225_v28  ;;  %v3191_v32 = vpop.f32.mrb[3].mxu1 }
 0x388   : > { %1348 = vrot.lane.b32.xlu0 %v4674_v31, %s3971_s22  ;;  %1238 = vrot.lane.b32.xlu1 %v4674_v31, %s3972_s9 }
 0x38c   : > { %1350 = vrot.lane.b32.xlu1 %v4674_v31, %s3973_s26 }
 0x390   : > { %1460 = vrot.lane.b32.xlu1 %v4674_v31, %s3974_s25 }
 0x394   : > { %1458 = vrot.lane.b32.xlu1 %v4674_v31, %s3975_s10 }
 0x398   : > { %1570 = vrot.lane.b32.xlu1 %v4674_v31, %s3976_s13 }
 0x39c   : > { %1568 = vrot.lane.b32.xlu1 %v4674_v31, %s3977_s16 }
 0x3fa   : > { %v1239_v33 = vpop.permute.xlu1 %1238  ;;  %v1349_v38 = vpop.permute.xlu0 %1348 }
 0x3fb   : > { %v1245_v34 = vsel %vm1240_vm5, %v1239_v33, 0 }
 0x3fc   : > { %3193 = vmatpush3.bf16.xpose.msra.mxu1 %v1245_v34 }
 0x3fd   : > { %3204 = vmatprep.subr.bf16.mxu1 %v3969_v9 }
 0x3fe   : > { %v1351_v35 = vpop.permute.xlu1 %1350 }
 0x3ff   : > { %v1356_v36 = vsel %vm1240_vm5, %v1351_v35, 0 }
 0x402   : > { %v1461_v37 = vpop.permute.xlu1 %1460 }
 0x403   : > { %3195 = vmatmul.mubr.msk.bf16.vlgmr.msra.gmra.mrb[4].mxu1 %vm1240_vm5, %v4674_v31  ;;  %v1466_v40 = vsel %vm1240_vm5, %v1461_v37, 0 }
 0x404   : > { %3205 = vmatpush3.bf16.xpose.msra.mxu1 %v1356_v36  ;;  %3206 = vmatprep.mubr.msk.bf16.mxu1 %vm3970_vm2, %v3969_v9 }
 0x405   : > { %3216 = vmatprep.subr.bf16.mxu1 %v3969_v9 }
 0x406   : > { %v1459_v39 = vpop.permute.xlu1 %1458 }
 0x40a   : > { %v1571_v41 = vpop.permute.xlu1 %1570 }
 0x40b   : > { %3207 = vmatmul.mubr.msk.bf16.vlgmr.msra.gmra.mrb[8].mxu1 %vm1240_vm5, %v1349_v38  ;;  %v1576_v42 = vsel %vm1240_vm5, %v1571_v41, 0 }
 0x40c   : > { %3217 = vmatpush3.bf16.xpose.msra.mxu1 %v1466_v40  ;;  %3218 = vmatprep.mubr.msk.bf16.mxu1 %vm3970_vm2, %v3969_v9 }
 0x40d   : > { %3228 = vmatprep.subr.bf16.mxu1 %v3969_v9 }
 0x40e   : > { %v1569_v43 = vpop.permute.xlu1 %1568 }
 0x413   : > { %3219 = vmatmul.mubr.msk.bf16.vlgmr.msra.gmra.mrb[12].mxu1 %vm1240_vm5, %v1459_v39 }
 0x414   : > { %3229 = vmatpush3.bf16.xpose.msra.mxu1 %v1576_v42  ;;  %3230 = vmatprep.mubr.msk.bf16.mxu1 %vm3970_vm2, %v3969_v9 }
 0x415   : > { %3240 = vmatprep.subr.bf16.mxu1 %v3969_v9 }
 0x41b   : > { %3231 = vmatmul.mubr.msk.bf16.vlgmr.msra.gmra.mrb[16].mxu1 %vm1240_vm5, %v1569_v43 }
 0x41c   : > { %3244 = vmatprep.mubr.msk.bf16.mxu1 %vm3970_vm2, %v3969_v9 }
 0x4d6   : > { %v1281_v46 = vpop.f32.mrb[4].mxu1 }
 0x4d7   : > { %v1282_v47 = vadd.f32 %v1281_v46, %v1236_v45  ;;  %v3196_v48 = vpop.f32.mrb[5].mxu1 }
 0x4d8   : > { %v1284_v49 = vpop.f32.mrb[6].mxu1 }
 0x4d9   : > { %v3197_v50 = vpop.f32.mrb[7].mxu1  ;;  %v1287_v51 = vsel %vm1240_vm5, %v1282_v47, -inf }
 0x4da   : > { %1288 = vmax.xlane.f32.xlu1 %v1287_v51 }
 0x4de   : > { %v1392_v52 = vpop.f32.mrb[8].mxu1 }
 0x4df   : > { %v1393_v53 = vadd.f32 %v1392_v52, %v1236_v45  ;;  %v3208_v54 = vpop.f32.mrb[9].mxu1 }
 0x4e0   : > { %v1395_v55 = vpop.f32.mrb[10].mxu1 }
 0x4e1   : > { %v3209_v56 = vpop.f32.mrb[11].mxu1  ;;  %v1398_v57 = vsel %vm1240_vm5, %v1393_v53, -inf }
 0x4e2   : > { %1399 = vmax.xlane.f32.xlu0 %v1398_v57 }
 0x4e6   : > { %v1502_v58 = vpop.f32.mrb[12].mxu1 }
 0x4e7   : > { %v1503_v59 = vadd.f32 %v1502_v58, %v1236_v45  ;;  %v3220_v60 = vpop.f32.mrb[13].mxu1 }
 0x4e8   : > { %v1505_v61 = vpop.f32.mrb[14].mxu1  ;;  %v3508_v60 = vld [vmem:[%s4607_s14] sm:$0xff]  }
 0x4e9   : > { %v3221_v62 = vpop.f32.mrb[15].mxu1  ;;  %v1508_v63 = vsel %vm1240_vm5, %v1503_v59, -inf  ;;  %3241 = vmatpush3.bf16.msra.mxu1 %v3508_v60  ;;  %v3509_v61 = vld [vmem:[%s4607_s14 + $0x8] sm:$0xff]   ;;  %s5157_s14 = scalar_lea.vmem [#allocation12], %s4558_s24  ;;  %s5158_s24 = scalar_lea.vmem [#allocation6], %s4537_s3 }
 0x4ea   : > { %1509 = vmax.xlane.f32.xlu1 %v1508_v63  ;;  %3242 = vmatprep.subr.bf16.mxu1 %v3969_v9 }
 0x4ed   : > { %3243 = vmatpush3.bf16.msra.mxu1 %v3509_v61 }
 0x4ee   : > { %v1612_v0 = vpop.f32.mrb[16].mxu1  ;;  %3256 = vmatprep.subr.bf16.mxu1 %v3969_v9 }
 0x4ef   : > { %v1613_v2 = vadd.f32 %v1612_v0, %v1236_v45  ;;  %v3232_v3 = vpop.f32.mrb[17].mxu1 }
 0x4f0   : > { %v1615_v4 = vpop.f32.mrb[18].mxu1 }
 0x4f1   : > { %v3233_v5 = vpop.f32.mrb[19].mxu1  ;;  %v1618_v6 = vsel %vm1240_vm5, %v1613_v2, -inf }
 0x4f2   : > { %1619 = vmax.xlane.f32.xlu0 %v1618_v6 }
 0x567   : > { %v1289_v7 = vpop.xlane.xlu1 %1288 }
 0x568   : > { %v1290_v8 = vsub.f32 %v1282_v47, %v1289_v7 }
 0x56a   : > { %v1291_v10 = vmul.f32 1.442695, %v1290_v8 }
 0x56c   : > { %3527 = vpow2.f32 %v1291_v10 }
 0x56f   : > { %v1400_v11 = vpop.xlane.xlu0 %1399 }
 0x570   : > { %v1401_v12 = vsub.f32 %v1393_v53, %v1400_v11 }
 0x572   : > { %v1402_v13 = vmul.f32 1.442695, %v1401_v12 }
 0x574   : > { %3529 = vpow2.f32 %v1402_v13 }
 0x576   : > { %v3528_v14 = vpop.eup %3527 }
 0x577   : > { %v1293_v15 = vsel %vm1240_vm5, %v3528_v14, 0.0  ;;  %v1510_v23 = vpop.xlane.xlu1 %1509 }
 0x578   : > { %1294 = vadd.xlane.f32.xlu1 %v1293_v15  ;;  %v1511_v24 = vsub.f32 %v1503_v59, %v1510_v23  ;;  %v3074_v15 = vld [vmem:[%s5157_s14] ss:$0 sm:$0xff] }
 0x57a   : > { %v1512_v25 = vmul.f32 1.442695, %v1511_v24 }
 0x57e   : > { %v3530_v16 = vpop.eup %3529 }
 0x57f   : > { %v1620_v17 = vpop.xlane.xlu0 %1619  ;;  %v1404_v18 = vsel %vm1240_vm5, %v3530_v16, 0.0 }
 0x580   : > { %v1621_v19 = vsub.f32 %v1613_v2, %v1620_v17  ;;  %1405 = vadd.xlane.f32.xlu0 %v1404_v18 }
 0x582   : > { %v1622_v20 = vmul.f32 1.442695, %v1621_v19 }
 0x584   : > { %3531 = vpow2.f32 %v1622_v20 }
 0x585   : > { %3533 = vpow2.f32 %v1512_v25 }
 0x589   : > { %1299 = vrot.lane.b32.xlu1 %v4674_v31, %s3978_s5 }
 0x58e   : > { %v3532_v21 = vpop.eup %3531 }
 0x58f   : > { %v1624_v22 = vsel %vm1240_vm5, %v3532_v21, 0.0  ;;  %v3534_v26 = vpop.eup %3533 }
 0x590   : > { %1625 = vadd.xlane.f32.xlu0 %v1624_v22  ;;  %v1514_v27 = vsel %vm1240_vm5, %v3534_v26, 0.0 }
 0x5a6   : > { %1410 = vrot.lane.b32.xlu0 %v4674_v31, %s3979_s11 }
 0x5ad   : > { %1515 = vadd.xlane.f32.xlu1 %v1514_v27 }
 0x5be   : > { %1520 = vrot.lane.b32.xlu1 %v4674_v31, %s3980_s21 }
 0x5c2   : > { %1630 = vrot.lane.b32.xlu1 %v4674_v31, %s3981_s27 }
 0x605   : > { %v1295_v28 = vpop.xlane.xlu1 %1294 }
 0x606   : > { %3535 = vrcp.f32 %v1295_v28  ;;  %v3510_v28 = vld [vmem:[%s4621_s6] sm:$0xff]  }
 0x609   : > { %v1300_v29 = vpop.permute.xlu1 %1299 }
 0x60a   : > { %v1306_v30 = vsel %vm1304_vm6, %v1300_v29, 0  ;;  %v3511_v29 = vld [vmem:[%s4621_s6 + $0x8] sm:$0xff]  }
 0x60b   : > { %3199 = vmatpush3.bf16.msra.mxu0 %v1306_v30  ;;  %v3514_v30 = vld [vmem:[%s4612_s7 + $0x8] sm:$0xff]  }
 0x60c   : > { %3210 = vmatprep.subr.bf16.mxu0 %v3969_v9 }
 0x60d   : > { %v1406_v33 = vpop.xlane.xlu0 %1405 }
 0x60e   : > { %3537 = vrcp.f32 %v1406_v33 }
 0x610   : > { %v3536_v32 = vpop.eup %3535 }
 0x611   : > { %v1297_v34 = vmul.f32 %v3536_v32, %v3528_v14  ;;  %v3512_v32 = vld [vmem:[%s5158_s24] sm:$0xff]  }
 0x613   : > { %v1298_v35 = vpack.c.bf16 %v1297_v34, %v1297_v34 }
 0x615   : > { %3201 = vmatmul.mubr.msk.bf16.vlgmr.msra.gmra.mrb[0].mxu0 %vm1240_vm5, %v1298_v35 }
 0x616   : > { %3212 = vmatprep.mubr.msk.bf16.mxu0 %vm3970_vm2, %v3969_v9 }
 0x618   : > { %v3538_v31 = vpop.eup %3537 }
 0x619   : > { %v1408_v37 = vmul.f32 %v3538_v31, %v3530_v16 }
 0x61b   : > { %v1409_v40 = vpack.c.bf16 %v1408_v37, %v1408_v37 }
 0x61d   : > { %v1626_v36 = vpop.xlane.xlu0 %1625 }
 0x621   : > { %v1411_v38 = vpop.permute.xlu0 %1410 }
 0x622   : > { %v1416_v39 = vsel %vm1304_vm6, %v1411_v38, 0 }
 0x623   : > { %3211 = vmatpush3.bf16.msra.mxu0 %v1416_v39 }
 0x624   : > { %3222 = vmatprep.subr.bf16.mxu0 %v3969_v9 }
 0x626   : > { %3213 = vmatmul.mubr.msk.bf16.vlgmr.msra.gmra.mrb[4].mxu0 %vm1240_vm5, %v1409_v40 }
 0x627   : > { %3224 = vmatprep.mubr.msk.bf16.mxu0 %vm3970_vm2, %v3969_v9 }
 0x63a   : > { %v1516_v41 = vpop.xlane.xlu1 %1515 }
 0x63b   : > { %3539 = vrcp.f32 %v1516_v41  ;;  %v3078_v41 = vld [vmem:[%s4592_s15 + $0x1] ss:$0 sm:$0xff] }
 0x63c   : > { %3541 = vrcp.f32 %v1626_v36 }
 0x63e   : > { %v1521_v42 = vpop.permute.xlu1 %1520 }
 0x63f   : > { %v1526_v43 = vsel %vm1304_vm6, %v1521_v42, 0 }
 0x640   : > { %3223 = vmatpush3.bf16.msra.mxu0 %v1526_v43  ;;  %v3079_v43 = vld [vmem:[%s4597_s18 + $0x1] ss:$0 sm:$0xff] }
 0x641   : > { %3234 = vmatprep.subr.bf16.mxu0 %v3969_v9 }
 0x642   : > { %v1631_v46 = vpop.permute.xlu1 %1630 }
 0x643   : > { %v1636_v49 = vsel %vm1304_vm6, %v1631_v46, 0 }
 0x645   : > { %v3540_v44 = vpop.eup %3539 }
 0x646   : > { %v1518_v45 = vmul.f32 %v3540_v44, %v3534_v26  ;;  %v3542_v48 = vpop.eup %3541 }
 0x647   : > { %v1628_v50 = vmul.f32 %v3542_v48, %v3532_v21 }
 0x648   : > { %v1519_v47 = vpack.c.bf16 %v1518_v45, %v1518_v45 }
 0x649   : > { %v1629_v51 = vpack.c.bf16 %v1628_v50, %v1628_v50 }
 0x64a   : > { %3225 = vmatmul.mubr.msk.bf16.vlgmr.msra.gmra.mrb[8].mxu0 %vm1240_vm5, %v1519_v47  ;;  %v3084_v47 = vld [vmem:[%s1101_s19] ss:$0 sm:$0xff]  ;;  %s5160_s19 = sld [smem:[#allocation55_spill]] }
 0x64b   : > { %3235 = vmatpush3.bf16.msra.mxu0 %v1636_v49  ;;  %3236 = vmatprep.mubr.msk.bf16.mxu0 %vm3970_vm2, %v3969_v9 }
 0x64c   : > { %3248 = vmatprep.subr.bf16.mxu0 %v3969_v9 }
 0x650   : > { %s5161_s20 = scalar_lea.vmem %s5160_s19, %s4585_s12 }
 0x652   : > { %3237 = vmatmul.mubr.msk.bf16.vlgmr.msra.gmra.mrb[12].mxu0 %vm1240_vm5, %v1629_v51 }
 0x653   : > { %3252 = vmatprep.mubr.msk.bf16.mxu0 %vm3970_vm2, %v3969_v9 }
 0x6e8   : > { %v1342_v52 = vpop.f32.mrb[0].mxu0 }
 0x6e9   : > { %v3202_v53 = vpop.f32.mrb[1].mxu0 }
 0x6ea   : > { %v1345_v54 = vpop.f32.mrb[2].mxu0 }
 0x6eb   : > { %v3203_v55 = vpop.f32.mrb[3].mxu0 }
 0x6f9   : > { %v1452_v56 = vpop.f32.mrb[4].mxu0 }
 0x6fa   : > { %1679 = vrot.lane.b32.xlu0 %v1452_v56, %s3982_s8  ;;  %v3214_v57 = vpop.f32.mrb[5].mxu0  ;;  %v3080_v56 = vld [vmem:[%s5161_s20] ss:$0 sm:$0xff] }
 0x6fb   : > { %v1455_v58 = vpop.f32.mrb[6].mxu0 }
 0x6fc   : > { %v3215_v59 = vpop.f32.mrb[7].mxu0 }
 0x71d   : > { %v1562_v62 = vpop.f32.mrb[8].mxu0 }
 0x71e   : > { %1683 = vrot.lane.b32.xlu1 %v1562_v62, %s3983_s2  ;;  %v3226_v63 = vpop.f32.mrb[9].mxu0 }
 0x71f   : > { %v1565_v0 = vpop.f32.mrb[10].mxu0 }
 0x720   : > { %v3227_v2 = vpop.f32.mrb[11].mxu0 }
 0x725   : > { %v1672_v3 = vpop.f32.mrb[12].mxu0 }
 0x726   : > { %1687 = vrot.lane.b32.xlu0 %v1672_v3, %s3984_s0  ;;  %v3238_v4 = vpop.f32.mrb[13].mxu0 }
 0x727   : > { %v1675_v5 = vpop.f32.mrb[14].mxu0 }
 0x728   : > { %v3239_v6 = vpop.f32.mrb[15].mxu0 }
 0x76c   : > { %v1680_v7 = vpop.permute.xlu0 %1679 }
 0x76d   : > { %v1690_v10 = vsel %vm1240_vm5, %v1342_v52, %v1680_v7 }
 0x790   : > { %v1684_v8 = vpop.permute.xlu1 %1683 }
 0x791   : > { %v1692_v11 = vsel %vm1691_vm7, %v1690_v10, %v1684_v8 }
 0x798   : > { %v1688_v12 = vpop.permute.xlu0 %1687 }
 0x799   : > { %v1694_v13 = vsel %vm1693_vm8, %v1692_v11, %v1688_v12 }
 0x79a   : > { %v1695_v14 = vpack.c.bf16 %v1694_v13, %v1694_v13 }
 0x79c   : > { %3245 = vmatmul.mubr.msk.bf16.vlgmr.msra.gmra.mrb[20].mxu1 %vm1130_vm1, %v1695_v14 }
 0x79d   : > { %3260 = vmatprep.mubr.msk.bf16.mxu1 %vm3970_vm2, %v3969_v9  ;;  %3257 = vmatpush3.bf16.msra.mxu1 %v3510_v28 }
 0x79e   : > { %3258 = vmatprep.subr.bf16.mxu1 %v3969_v9 }
 0x7a1   : > { %3259 = vmatpush3.bf16.msra.mxu1 %v3511_v29 }
 0x7a2   : > { %3270 = vmatprep.subr.bf16.mxu1 %v3969_v9 }
 0x7a4   : > { %3261 = vmatmul.mubr.msk.bf16.vlgmr.msra.gmra.mrb[24].mxu1 %vm1130_vm1, %v3512_v32 }
 0x7a5   : > { %3272 = vmatprep.mubr.msk.bf16.mxu1 %vm3970_vm2, %v3969_v9 }
 0x86f   : > { %v1751_v16 = vpop.f32.mrb[20].mxu1 }
 0x870   : > { %v1752_v17 = vadd.f32 %v3074_v15, %v1751_v16  ;;  %v3246_v18 = vpop.f32.mrb[21].mxu1 }
 0x871   : > { %v1754_v19 = vpop.f32.mrb[22].mxu1 }
 0x872   : > { %v4759_v20 = vadd.f32 %v1752_v17, %v4651_v1  ;;  %v3247_v21 = vpop.f32.mrb[23].mxu1  ;;  %v3513_v1 = vld [vmem:[%s4612_s7] sm:$0xff]  }
 0x873   : > { %3249 = vmatpush3.bf16.msra.mxu0 %v3513_v1 }
 0x874   : > { %v1760_v22 = vsel %vm1130_vm1, %v4759_v20, 0.0  ;;  %3250 = vmatprep.subr.bf16.mxu0 %v3969_v9 }
 0x875   : > { %1761 = vadd.xlane.f32.xlu1 %v1760_v22 }
 0x877   : > { %3251 = vmatpush3.bf16.msra.mxu0 %v3514_v30  ;;  %v1923_v48 = vpop.f32.mrb[24].mxu1 }
 0x878   : > { %3264 = vmatprep.subr.bf16.mxu0 %v3969_v9  ;;  %v1924_v49 = vadd.f32 %v3084_v47, %v1923_v48  ;;  %v3262_v50 = vpop.f32.mrb[25].mxu1 }
 0x879   : > { %v1926_v51 = vpop.f32.mrb[26].mxu1 }
 0x87a   : > { %v1927_v52 = vadd.f32 %v3084_v47, %v1926_v51  ;;  %v3263_v53 = vpop.f32.mrb[27].mxu1 }
 0x87c   : > { %v4788_v54 = vpack.c.bf16 %v1927_v52, %v1924_v49 }
 0x87e   : > { %v1941_v55 = vsel %vm1240_vm5, %v4788_v54, 0 }
 0x902   : > { %v1762_v23 = vpop.xlane.xlu1 %1761 }
 0x903   : > { %v1763_v24 = vmul.f32 0.03125, %v1762_v23 }
 0x905   : > { %v1764_v25 = vsub.f32 %v4759_v20, %v1763_v24 }
 0x907   : > { %v1765_v26 = vmul.f32 %v1764_v25, %v1764_v25 }
 0x909   : > { %v1766_v27 = vsel %vm1130_vm1, %v1765_v26, 0.0 }
 0x90a   : > { %1767 = vadd.xlane.f32.xlu0 %v1766_v27 }
 0x920   : > { %2045 = vrot.lane.b32.xlu0 %v4788_v54, %s3971_s22 }
 0x997   : > { %v1768_v33 = vpop.xlane.xlu0 %1767 }
 0x998   : > { %v1769_v34 = vmul.f32 0.032258064, %v1768_v33 }
 0x99a   : > { %3543 = vrsqrt.f32 %v1769_v34  ;;  %vm1772_vm9 = vcmp.eq.f32.partialorder %v1769_v34, inf  ;;  %v1775_v36 = vand.u32 2147483648, %v1769_v34  ;;  %vm1774_vm10 = vcmp.eq.f32.partialorder %v1769_v34, 0.0 }
 0x99b   : > { %v2046_v60 = vpop.permute.xlu0 %2045 }
 0x99c   : > { %v2051_v0 = vsel %vm1240_vm5, %v2046_v60, 0 }
 0x9a4   : > { %v3544_v35 = vpop.eup %3543 }
 0x9a5   : > { %v1771_v31 = vmul.f32 %v3544_v35, %v1769_v34 }
 0x9a7   : > { %v1773_v37 = vsel %vm1772_vm9, %v1769_v34, %v1771_v31 }
 0x9a8   : > { %v1776_v38 = vsel %vm1774_vm10, %v1775_v36, %v1773_v37 }
 0x9a9   : > { %v1777_v39 = vadd.f32 1e-06, %v1776_v38 }
 0x9ab   : > { %3545 = vrcp.f32 %v1777_v39 }
 0x9b5   : > { %v3546_v40 = vpop.eup %3545 }
 0x9b6   : > { %v1780_v42 = vmul.f32 %v3546_v40, %v1764_v25 }
 0x9b8   : > { %v1785_v44 = vmul.f32 %v3078_v41, %v1780_v42 }
 0x9ba   : > { %v1790_v45 = vadd.f32 %v3079_v43, %v1785_v44 }
 0x9bc   : > { %v1791_v46 = vpack.c.bf16 %v1790_v45, %v1790_v45 }
 0x9be   : > { %3253 = vmatmul.mubr.msk.bf16.vlgmr.msra.gmra.mrb[16].mxu0 %vm1130_vm1, %v1791_v46 }
 0x9bf   : > { %3266 = vmatprep.mubr.msk.bf16.mxu0 %vm3970_vm2, %v3969_v9  ;;  %3265 = vmatpush3.bf16.xpose.msra.mxu0 %v1941_v55 }
 0x9c0   : > { %3276 = vmatprep.subr.bf16.mxu0 %v3969_v9 }
 0xa91   : > { %v1852_v57 = vpop.f32.mrb[16].mxu0 }
 0xa92   : > { %v1853_v58 = vadd.f32 %v3080_v56, %v1852_v57  ;;  %v3254_v59 = vpop.f32.mrb[17].mxu0 }
 0xa93   : > { %v1855_v61 = vpop.f32.mrb[18].mxu0 }
 0xa94   : > { %v1935_v62 = vpack.c.bf16 %v1853_v58, %v1853_v58  ;;  %v3255_v63 = vpop.f32.mrb[19].mxu0 }
 0xa96   : > { %2043 = vrot.lane.b32.xlu1 %v1935_v62, %s3971_s22  ;;  %2151 = vrot.lane.b32.xlu0 %v1935_v62, %s3975_s10  ;;  %s5162_s22 = sld [smem:[#allocation42_spill]] }
 0xa97   : > { %3267 = vmatmul.mubr.msk.bf16.vlgmr.msra.gmra.mrb[20].mxu0 %vm1240_vm5, %v1935_v62 }
 0xa98   : > { %3277 = vmatpush3.bf16.xpose.msra.mxu0 %v2051_v0  ;;  %3278 = vmatprep.mubr.msk.bf16.mxu0 %vm3970_vm2, %v3969_v9 }
 0xa99   : > { %3288 = vmatprep.subr.bf16.mxu0 %v3969_v9 }
 0xa9a   : > { %2153 = vrot.lane.b32.xlu1 %v4788_v54, %s3975_s10  ;;  %2259 = vrot.lane.b32.xlu0 %v1935_v62, %s3977_s16  ;;  %s5164_s10 = sld [smem:[#allocation43_spill]] }
 0xa9e   : > { %2261 = vrot.lane.b32.xlu1 %v4788_v54, %s3977_s16 }
 0xb08   : > { %v2044_v2 = vpop.permute.xlu1 %2043  ;;  %v2152_v6 = vpop.permute.xlu0 %2151 }
 0xb09   : > { %3279 = vmatmul.mubr.msk.bf16.vlgmr.msra.gmra.mrb[24].mxu0 %vm1240_vm5, %v2044_v2 }
 0xb0a   : > { %3290 = vmatprep.mubr.msk.bf16.mxu0 %vm3970_vm2, %v3969_v9 }
 0xb0c   : > { %v2154_v3 = vpop.permute.xlu1 %2153  ;;  %v2260_v8 = vpop.permute.xlu0 %2259 }
 0xb0d   : > { %v2159_v4 = vsel %vm1240_vm5, %v2154_v3, 0 }
 0xb0e   : > { %3289 = vmatpush3.bf16.xpose.msra.mxu0 %v2159_v4 }
 0xb0f   : > { %3300 = vmatprep.subr.bf16.mxu0 %v3969_v9 }
 0xb10   : > { %v2262_v5 = vpop.permute.xlu1 %2261 }
 0xb11   : > { %v2267_v7 = vsel %vm1240_vm5, %v2262_v5, 0 }
 0xb15   : > { %3291 = vmatmul.mubr.msk.bf16.vlgmr.msra.gmra.mrb[28].mxu0 %vm1240_vm5, %v2152_v6 }
 0xb16   : > { %3301 = vmatpush3.bf16.xpose.msra.mxu0 %v2267_v7  ;;  %3302 = vmatprep.mubr.msk.bf16.mxu0 %vm3970_vm2, %v3969_v9 }
 0xb17   : > { %3312 = vmatprep.subr.bf16.mxu0 %v3969_v9 }
 0xb1d   : > { %3303 = vmatmul.mubr.msk.bf16.vlgmr.msra.gmra.mrb[32].mxu0 %vm1240_vm5, %v2260_v8 }
 0xb1e   : > { %3316 = vmatprep.mubr.msk.bf16.mxu0 %vm3970_vm2, %v3969_v9 }
 0xb6a   : > { %v1977_v10 = vpop.f32.mrb[20].mxu0 }
 0xb6b   : > { %v3268_v11 = vpop.f32.mrb[21].mxu0  ;;  %v1983_v12 = vsel %vm1691_vm7, %v1977_v10, -inf }
 0xb6c   : > { %1984 = vmax.xlane.f32.xlu1 %v1983_v12  ;;  %v1980_v13 = vpop.f32.mrb[22].mxu0 }
 0xb6d   : > { %v3269_v14 = vpop.f32.mrb[23].mxu0 }
 0xbdc   : > { %v2087_v15 = vpop.f32.mrb[24].mxu0 }
 0xbdd   : > { %v3280_v16 = vpop.f32.mrb[25].mxu0  ;;  %v2093_v17 = vsel %vm1691_vm7, %v2087_v15, -inf }
 0xbde   : > { %2094 = vmax.xlane.f32.xlu0 %v2093_v17  ;;  %v2090_v18 = vpop.f32.mrb[26].mxu0  ;;  %v3515_v16 = vld [vmem:[%s5162_s22] sm:$0xff]   ;;  %v3516_v17 = vld [vmem:[%s5162_s22 + $0x8] sm:$0xff]  }
 0xbdf   : > { %v3281_v19 = vpop.f32.mrb[27].mxu0  ;;  %3313 = vmatpush3.bf16.msra.mxu0 %v3515_v16 }
 0xbe0   : > { %3314 = vmatprep.subr.bf16.mxu0 %v3969_v9 }
 0xbe3   : > { %3315 = vmatpush3.bf16.msra.mxu0 %v3516_v17 }
 0xbe4   : > { %3328 = vmatprep.subr.bf16.mxu0 %v3969_v9 }
 0xbe8   : > { %v2195_v21 = vpop.f32.mrb[28].mxu0 }
 0xbe9   : > { %v3292_v22 = vpop.f32.mrb[29].mxu0  ;;  %v2201_v23 = vsel %vm1691_vm7, %v2195_v21, -inf }
 0xbea   : > { %2202 = vmax.xlane.f32.xlu0 %v2201_v23  ;;  %v2198_v24 = vpop.f32.mrb[30].mxu0 }
 0xbeb   : > { %v3293_v25 = vpop.f32.mrb[31].mxu0 }
 0xbf0   : > { %v2303_v26 = vpop.f32.mrb[32].mxu0 }
 0xbf1   : > { %v3304_v27 = vpop.f32.mrb[33].mxu0  ;;  %v2309_v28 = vsel %vm1691_vm7, %v2303_v26, -inf }
 0xbf2   : > { %2310 = vmax.xlane.f32.xlu1 %v2309_v28  ;;  %v2306_v29 = vpop.f32.mrb[34].mxu0 }
 0xbf3   : > { %v3305_v1 = vpop.f32.mrb[35].mxu0 }
 0xbf9   : > { %v1985_v30 = vpop.xlane.xlu1 %1984 }
 0xbfa   : > { %v1986_v32 = vsub.f32 %v1977_v10, %v1985_v30 }
 0xbfc   : > { %v1987_v33 = vmul.f32 1.442695, %v1986_v32 }
 0xbfe   : > { %3547 = vpow2.f32 %v1987_v33 }
 0xc08   : > { %v3548_v34 = vpop.eup %3547 }
 0xc09   : > { %v1989_v35 = vsel %vm1691_vm7, %v3548_v34, 0.0 }
 0xc0a   : > { %1990 = vadd.xlane.f32.xlu0 %v1989_v35 }
 0xc6b   : > { %v2095_v31 = vpop.xlane.xlu0 %2094 }
 0xc6c   : > { %v2096_v36 = vsub.f32 %v2087_v15, %v2095_v31 }
 0xc6e   : > { %v2097_v37 = vmul.f32 1.442695, %v2096_v36 }
 0xc70   : > { %3549 = vpow2.f32 %v2097_v37 }
 0xc77   : > { %v2203_v38 = vpop.xlane.xlu0 %2202 }
 0xc78   : > { %v2204_v39 = vsub.f32 %v2195_v21, %v2203_v38 }
 0xc7a   : > { %v3550_v40 = vpop.eup %3549  ;;  %v2205_v41 = vmul.f32 1.442695, %v2204_v39 }
 0xc7b   : > { %v2099_v42 = vsel %vm1691_vm7, %v3550_v40, 0.0 }
 0xc7c   : > { %3551 = vpow2.f32 %v2205_v41  ;;  %2100 = vadd.xlane.f32.xlu1 %v2099_v42 }
 0xc7f   : > { %v2311_v45 = vpop.xlane.xlu1 %2310 }
 0xc80   : > { %v2312_v46 = vsub.f32 %v2303_v26, %v2311_v45 }
 0xc82   : > { %v2313_v47 = vmul.f32 1.442695, %v2312_v46  ;;  %v3517_v46 = vld [vmem:[%s5164_s10] sm:$0xff]  }
 0xc84   : > { %3553 = vpow2.f32 %v2313_v47  ;;  %v3518_v47 = vld [vmem:[%s5164_s10 + $0x8] sm:$0xff]  }
 0xc86   : > { %v3552_v43 = vpop.eup %3551 }
 0xc87   : > { %v2207_v44 = vsel %vm1691_vm7, %v3552_v43, 0.0 }
 0xc88   : > { %2208 = vadd.xlane.f32.xlu0 %v2207_v44 }
 0xc8d   : > { %2105 = vrot.lane.b32.xlu1 %v4788_v54, %s3973_s26 }
 0xc8e   : > { %v3554_v48 = vpop.eup %3553 }
 0xc8f   : > { %v2315_v49 = vsel %vm1691_vm7, %v3554_v48, 0.0 }
 0xc97   : > { %v1991_v50 = vpop.xlane.xlu0 %1990 }
 0xc98   : > { %3555 = vrcp.f32 %v1991_v50 }
 0xc9e   : > { %1996 = vrot.lane.b32.xlu0 %v4788_v54, %s3972_s9 }
 0xca2   : > { %2321 = vrot.lane.b32.xlu0 %v4788_v54, %s3976_s13  ;;  %v3556_v52 = vpop.eup %3555 }
 0xca3   : > { %v1993_v55 = vmul.f32 %v3556_v52, %v3548_v34  ;;  %v3097_v34 = vld [vmem:[%s1104_s4] ss:$0 sm:$0xff] }
 0xca5   : > { %v1994_v57 = vpack.c.bf16 %v1993_v55, %v1993_v55 }
 0xcb1   : > { %2316 = vadd.xlane.f32.xlu1 %v2315_v49 }
 0xcc2   : > { %2213 = vrot.lane.b32.xlu1 %v4788_v54, %s3974_s25 }
 0xd09   : > { %v2101_v51 = vpop.xlane.xlu1 %2100 }
 0xd0a   : > { %3557 = vrcp.f32 %v2101_v51 }
 0xd0d   : > { %v2106_v59 = vpop.permute.xlu1 %2105 }
 0xd14   : > { %v3558_v58 = vpop.eup %3557 }
 0xd15   : > { %v2209_v53 = vpop.xlane.xlu0 %2208  ;;  %v2103_v54 = vmul.f32 %v3558_v58, %v3550_v40 }
 0xd16   : > { %3559 = vrcp.f32 %v2209_v53 }
 0xd17   : > { %v2104_v60 = vpack.c.bf16 %v2103_v54, %v2103_v54 }
 0xd19   : > { %v1997_v56 = vpop.permute.xlu0 %1996 }
 0xd1a   : > { %3271 = vmatpush3.bf16.msra.mxu1 %v1997_v56 }
 0xd1b   : > { %3282 = vmatprep.subr.bf16.mxu1 %v3969_v9 }
 0xd1d   : > { %3273 = vmatmul.mubr.msk.bf16.vlgmr.msra.gmra.mrb[28].mxu1 %vm1691_vm7, %v1994_v57  ;;  %v2322_v3 = vpop.permute.xlu0 %2321 }
 0xd1e   : > { %3283 = vmatpush3.bf16.msra.mxu1 %v2106_v59  ;;  %3284 = vmatprep.mubr.msk.bf16.mxu1 %vm3970_vm2, %v3969_v9  ;;  %v3101_v59 = vld [vmem:[%s4592_s15 + $0x2] ss:$0 sm:$0xff] }
 0xd1f   : > { %3294 = vmatprep.subr.bf16.mxu1 %v3969_v9 }
 0xd20   : > { %v3560_v61 = vpop.eup %3559 }
 0xd21   : > { %v2211_v63 = vmul.f32 %v3560_v61, %v3552_v43 }
 0xd23   : > { %v2212_v2 = vpack.c.bf16 %v2211_v63, %v2211_v63 }
 0xd25   : > { %3285 = vmatmul.mubr.msk.bf16.vlgmr.msra.gmra.mrb[32].mxu1 %vm1691_vm7, %v2104_v60  ;;  %v3102_v60 = vld [vmem:[%s4597_s18 + $0x2] ss:$0 sm:$0xff] }
 0xd26   : > { %3296 = vmatprep.mubr.msk.bf16.mxu1 %vm3970_vm2, %v3969_v9 }
 0xd3e   : > { %v2317_v62 = vpop.xlane.xlu1 %2316 }
 0xd3f   : > { %3561 = vrcp.f32 %v2317_v62 }
 0xd42   : > { %v2214_v0 = vpop.permute.xlu1 %2213 }
 0xd43   : > { %3295 = vmatpush3.bf16.msra.mxu1 %v2214_v0  ;;  %v3521_v0 = vld [vmem:[%s4643_s28 + $0x10] sm:$0xff]  }
 0xd44   : > { %3306 = vmatprep.subr.bf16.mxu1 %v3969_v9 }
 0xd46   : > { %3297 = vmatmul.mubr.msk.bf16.vlgmr.msra.gmra.mrb[36].mxu1 %vm1691_vm7, %v2212_v2  ;;  %v3522_v2 = vld [vmem:[%s4643_s28 + $0x18] sm:$0xff]  }
 0xd47   : > { %3307 = vmatpush3.bf16.msra.mxu1 %v2322_v3  ;;  %3308 = vmatprep.mubr.msk.bf16.mxu1 %vm3970_vm2, %v3969_v9  ;;  %v3103_v3 = vld [vmem:[%s1107_s23] ss:$0 sm:$0xff]  ;;  %s5167_s23 = sld [smem:[#allocation30_spill]] }
 0xd48   : > { %3320 = vmatprep.subr.bf16.mxu1 %v3969_v9 }
 0xd49   : > { %v3562_v4 = vpop.eup %3561 }
 0xd4a   : > { %v2319_v5 = vmul.f32 %v3562_v4, %v3554_v48  ;;  %v3519_v48 = vld [vmem:[%s4643_s28] sm:$0xff]  }
 0xd4c   : > { %v2320_v6 = vpack.c.bf16 %v2319_v5, %v2319_v5 }
 0xd4d   : > { %p3113_p13 = scmp.ne.s32.totalorder %s5167_s23, 1 }
 0xd4e   : > { %3309 = vmatmul.mubr.msk.bf16.vlgmr.msra.gmra.mrb[40].mxu1 %vm1691_vm7, %v2320_v6  ;;  %s5169_s27 = sld [smem:[#allocation65_spill]] (!%p3113_p13) }
 0xd4f   : > { %3324 = vmatprep.mubr.msk.bf16.mxu1 %vm3970_vm2, %v3969_v9  ;;  %3321 = vmatpush3.bf16.msra.mxu1 %v3517_v46 }
 0xd50   : > { %3322 = vmatprep.subr.bf16.mxu1 %v3969_v9 }
 0xd53   : > { %3323 = vmatpush3.bf16.msra.mxu1 %v3518_v47 }
 0xdf0   : > { %v2036_v7 = vpop.f32.mrb[28].mxu1 }
 0xdf1   : > { %v3274_v8 = vpop.f32.mrb[29].mxu1 }
 0xdf2   : > { %v2039_v10 = vpop.f32.mrb[30].mxu1 }
 0xdf3   : > { %v3275_v11 = vpop.f32.mrb[31].mxu1 }
 0xdf8   : > { %v2145_v12 = vpop.f32.mrb[32].mxu1 }
 0xdf9   : > { %2368 = vrot.lane.b32.xlu1 %v2145_v12, %s3982_s8  ;;  %v3286_v13 = vpop.f32.mrb[33].mxu1 }
 0xdfa   : > { %v2148_v14 = vpop.f32.mrb[34].mxu1 }
 0xdfb   : > { %v3287_v15 = vpop.f32.mrb[35].mxu1 }
 0xe19   : > { %v2253_v18 = vpop.f32.mrb[36].mxu1 }
 0xe1a   : > { %2372 = vrot.lane.b32.xlu0 %v2253_v18, %s3983_s2  ;;  %v3298_v19 = vpop.f32.mrb[37].mxu1 }
 0xe1b   : > { %v2256_v21 = vpop.f32.mrb[38].mxu1 }
 0xe1c   : > { %v3299_v22 = vpop.f32.mrb[39].mxu1 }
 0xe21   : > { %v2361_v23 = vpop.f32.mrb[40].mxu1 }
 0xe22   : > { %2376 = vrot.lane.b32.xlu1 %v2361_v23, %s3984_s0  ;;  %v3310_v24 = vpop.f32.mrb[41].mxu1 }
 0xe23   : > { %v2364_v25 = vpop.f32.mrb[42].mxu1 }
 0xe24   : > { %v3311_v26 = vpop.f32.mrb[43].mxu1 }
 0xe6b   : > { %v2369_v27 = vpop.permute.xlu1 %2368 }
 0xe6c   : > { %v2379_v29 = vsel %vm1240_vm5, %v2036_v7, %v2369_v27 }
 0xe8c   : > { %v2373_v28 = vpop.permute.xlu0 %2372 }
 0xe8d   : > { %v2380_v1 = vsel %vm1691_vm7, %v2379_v29, %v2373_v28 }
 0xe94   : > { %v2377_v30 = vpop.permute.xlu1 %2376 }
 0xe95   : > { %v2381_v32 = vsel %vm1693_vm8, %v2380_v1, %v2377_v30 }
 0xe96   : > { %v2382_v33 = vpack.c.bf16 %v2381_v32, %v2381_v32 }
 0xe98   : > { %3317 = vmatmul.mubr.msk.bf16.vlgmr.msra.gmra.mrb[36].mxu0 %vm1130_vm1, %v2382_v33 }
 0xe99   : > { %3336 = vmatprep.mubr.msk.bf16.mxu0 %vm3970_vm2, %v3969_v9  ;;  %3329 = vmatpush3.bf16.msra.mxu0 %v3519_v48 }
 0xe9a   : > { %3330 = vmatprep.subr.bf16.mxu0 %v3969_v9 }
 0xf6b   : > { %v2438_v35 = vpop.f32.mrb[36].mxu0 }
 0xf6c   : > { %v2439_v31 = vadd.f32 %v3097_v34, %v2438_v35  ;;  %v3318_v36 = vpop.f32.mrb[37].mxu0 }
 0xf6d   : > { %v2441_v37 = vpop.f32.mrb[38].mxu0 }
 0xf6e   : > { %v2444_v38 = vadd.f32 %v2439_v31, %v4759_v20  ;;  %v3319_v39 = vpop.f32.mrb[39].mxu0  ;;  %v3520_v20 = vld [vmem:[%s4643_s28 + $0x8] sm:$0xff]   ;;  %s5168_s28 = sld [smem:[#allocation64_spill]] (!%p3113_p13)  ;;  %v3115_v31 = vld [vmem:[%s5169_s27] ss:$0 sm:$0xff] (!%p3113_p13) }
 0xf6f   : > { %3331 = vmatpush3.bf16.msra.mxu0 %v3520_v20 }
 0xf70   : > { %v2447_v40 = vsel %vm1130_vm1, %v2444_v38, 0.0  ;;  %3332 = vmatprep.subr.bf16.mxu0 %v3969_v9 }
 0xf71   : > { %2448 = vadd.xlane.f32.xlu0 %v2447_v40 }
 0xf73   : > { %3333 = vmatpush3.bf16.msra.mxu0 %v3521_v0 }
 0xf74   : > { %3334 = vmatprep.subr.bf16.mxu0 %v3969_v9  ;;  %v3112_v9 = vld [vmem:[%s1115_s1] ss:$0 sm:$0xff] }
 0xf75   : > { %v3114_v34 = vld [vmem:[%s5168_s28] ss:$0 sm:$0xff] (!%p3113_p13) }
 0xf77   : > { %3335 = vmatpush3.bf16.msra.mxu0 %v3522_v2 }
 0xffe   : > { %v2449_v41 = vpop.xlane.xlu0 %2448 }
 0xfff   : > { %v2450_v42 = vmul.f32 0.03125, %v2449_v41 }
0x1001   : > { %v2451_v43 = vsub.f32 %v2444_v38, %v2450_v42 }
0x1003   : > { %v2452_v44 = vmul.f32 %v2451_v43, %v2451_v43 }
0x1005   : > { %v2453_v45 = vsel %vm1130_vm1, %v2452_v44, 0.0 }
0x1006   : > { %2454 = vadd.xlane.f32.xlu1 %v2453_v45 }
0x1093   : > { %v2455_v49 = vpop.xlane.xlu1 %2454 }
0x1094   : > { %v2456_v50 = vmul.f32 0.032258064, %v2455_v49 }
0x1096   : > { %3563 = vrsqrt.f32 %v2456_v50  ;;  %vm2459_vm11 = vcmp.eq.f32.partialorder %v2456_v50, inf  ;;  %v2462_v53 = vand.u32 2147483648, %v2456_v50  ;;  %vm2461_vm12 = vcmp.eq.f32.partialorder %v2456_v50, 0.0 }
0x10a0   : > { %v3564_v51 = vpop.eup %3563 }
0x10a1   : > { %v2458_v52 = vmul.f32 %v3564_v51, %v2456_v50 }
0x10a3   : > { %v2460_v55 = vsel %vm2459_vm11, %v2456_v50, %v2458_v52 }
0x10a4   : > { %v2463_v56 = vsel %vm2461_vm12, %v2462_v53, %v2460_v55 }
0x10a5   : > { %v2464_v57 = vadd.f32 1e-06, %v2463_v56 }
0x10a7   : > { %3565 = vrcp.f32 %v2464_v57 }
0x10b1   : > { %v3566_v58 = vpop.eup %3565 }
0x10b2   : > { %v2467_v54 = vmul.f32 %v3566_v58, %v2451_v43 }
0x10b4   : > { %v2472_v61 = vmul.f32 %v3101_v59, %v2467_v54 }
0x10b6   : > { %v2477_v62 = vadd.f32 %v3102_v60, %v2472_v61 }
0x10b8   : > { %v2478_v63 = vpack.c.bf16 %v2477_v62, %v2477_v62 }
0x10ba   : > { %3325 = vmatmul.mubr.msk.bf16.vlgmr.msra.gmra.mrb[44].mxu1 %vm1130_vm1, %v2478_v63 }
0x118d   : > { %v2539_v4 = vpop.f32.mrb[44].mxu1 }
0x118e   : > { %v2540_v5 = vadd.f32 %v3103_v3, %v2539_v4  ;;  %v3326_v6 = vpop.f32.mrb[45].mxu1 }
0x118f   : > { %v2542_v7 = vpop.f32.mrb[46].mxu1 }
0x1190   : > { %v2545_v8 = vmax.f32 %v2540_v5, 0.0  ;;  %v3327_v10 = vpop.f32.mrb[47].mxu1 }
0x1192   : > { %v2546_v11 = vpack.c.bf16 %v2545_v8, %v2545_v8 }
0x1194   : > { %3337 = vmatmul.mubr.msk.bf16.vlgmr.msra.gmra.mrb[40].mxu0 %vm2579_vm13, %v2546_v11 }
0x1266   : > { %2636 = sbr.rel (%p3113_p13) target bundleno = 5045 (0x13b5), region = 148 }
0x1267   : > { %v2617_v12 = vpop.f32.mrb[40].mxu0 }
0x1268   : > { %v2623_v13 = vadd.f32 %v2617_v12, %v2444_v38  ;;  %v3338_v14 = vpop.f32.mrb[41].mxu0 }
0x1269   : > { %v2620_v15 = vpop.f32.mrb[42].mxu0 }
0x126a   : > { %v2631_v16 = vadd.f32 %v3112_v9, %v2623_v13  ;;  %v3339_v17 = vpop.f32.mrb[43].mxu0 }
0x126c   : > { %2632 = vst.msk [vmem:[#allocation2] sm:$0xff] %vm1130_vm1, %v2631_v16  ;;  %v2639_v18 = vsel (!%p3113_p13), %vm1130_vm1, %v2631_v16, 0.0 }
0x126d   : > { %2640 = vadd.xlane.f32.xlu0 %v2639_v18 }
0x12fa   : > { %v2641_v19 = vpop.xlane.xlu0 %2640 }
0x12fb   : > { %v2642_v21 = vmul.f32 0.03125, %v2641_v19 }
0x12fd   : > { %v2643_v22 = vsub.f32 %v2631_v16, %v2642_v21 }
0x12ff   : > { %v2644_v23 = vmul.f32 %v2643_v22, %v2643_v22 }
0x1301   : > { %v2645_v24 = vsel %vm1130_vm1, %v2644_v23, 0.0 }
0x1302   : > { %2646 = vadd.xlane.f32.xlu0 %v2645_v24 }
0x138f   : > { %v2647_v25 = vpop.xlane.xlu0 %2646 }
0x1390   : > { %v2648_v26 = vmul.f32 0.032258064, %v2647_v25 }
0x1392   : > { %3567 = vrsqrt.f32 %v2648_v26  ;;  %vm2651_vm14 = vcmp.eq.f32.partialorder %v2648_v26, inf  ;;  %v2654_v29 = vand.u32 2147483648, %v2648_v26  ;;  %vm2653_vm15 = vcmp.eq.f32.partialorder %v2648_v26, 0.0 }
0x139c   : > { %v3568_v27 = vpop.eup %3567 }
0x139d   : > { %v2650_v28 = vmul.f32 %v3568_v27, %v2648_v26 }
0x139f   : > { %v2652_v1 = vsel %vm2651_vm14, %v2648_v26, %v2650_v28 }
0x13a0   : > { %v2655_v30 = vsel %vm2653_vm15, %v2654_v29, %v2652_v1 }
0x13a1   : > { %v2656_v32 = vadd.f32 1e-06, %v2655_v30 }
0x13a3   : > { %3569 = vrcp.f32 %v2656_v32 }
0x13ad   : > { %v3570_v33 = vpop.eup %3569 }
0x13ae   : > { %v2659_v35 = vmul.f32 %v3570_v33, %v2643_v22 }
0x13b0   : > { %v2666_v36 = vmul.f32 %v3114_v34, %v2659_v35 }
0x13b2   : > { %v2673_v37 = vadd.f32 %v3115_v31, %v2666_v36 }
0x13b4   : > { %2674 = vst.msk [vmem:[%s4646_s17] sm:$0xff] %vm1130_vm1, %v2673_v37 }
0x13b5 PF: > { %s5170_s8 = sld [smem:[#allocation30_spill]] }
0x13bb   : > { %p3116_p8 = scmp.eq.s32.totalorder %s5170_s8, 1 }
0x13bc   : > { %2679 = vst.msk [vmem:[%s4646_s17] sm:$0xff] (!%p3116_p8), %vm1130_vm1, %v2631_v16 }
0x13bd   : > { %2678 = sbr.rel (%p3116_p8) target bundleno = 5060 (0x13c4), region = 152 }
0x13c4 PF: > { %s5171_s2 = sld [smem:[#allocation31_spill]]  ;;  %s5172_s0 = sld [smem:[#allocation28_spill]] }
0x13c5   : > { %s5173_s14 = sld [smem:[#allocation36_spill]]  ;;  %s2694_s29 = sshll.u32 %s4646_s17, 4  ;;  %s2695_s29 = int_to_ptr.vmem [resolvable:$true] %s2694_s29 }
0x13c6   : > { %s5174_s6 = sld [smem:[#allocation66_spill]]  ;;  %s3807_s9 = scalar_lea.vmem %s2695_s29, 128 }
0x13c7   : > { %p3808_p11 = scmp.ne.s32.totalorder %s2695_s29, %s3807_s9  ;;  %s3985_s26 = smov [#allocation15]  }
0x13c8   : > { %s3811_s25 = sshll.u32 %s3985_s26, 4  ;;  %s3812_s25 = int_to_ptr.vmem [resolvable:$false] %s3811_s25 }
0x13c9   : > { %s3813_s10 = scalar_lea.vmem %s3812_s25, 256  ;;  %p3814_p1 = scmp.lt.s32.totalorder %s2695_s29, %s3812_s25 }
0x13ca   : > { %s3118_s24 = sshll.u32 %s5171_s2, 7  ;;  %s5176_s20 = sand.u32 1, %s5172_s0  }
0x13cb   : > { %s2681_s22 = scalar_lea.sflag [#allocation5], %s5176_s20  ;;  %p5177_p9 = scmp.ne.s32.totalorder %s5173_s14, 0 }
0x13cc   : > { %s5175_s19 = smov %s5174_s6  ;;  %s4920_s30 = scalar_lea.hbm %s5174_s6, %s3118_s24 }
0x13cd   : > { %p3809_p7 = pnand %p3808_p11, %p5177_p9  ;;  %p3815_p4 = scmp.lt.s32.totalorder %s3813_s10, %s3807_s9 }
0x13cf   : > { %p3810_p5 = pneg %p3809_p7  ;;  %p3816_p0 = por %p3815_p4, %p3814_p1 }
0x13d1   : > { %p3817_p3 = pnand %p3816_p0, %p3810_p5 }
0x13d3   : > { %3820 = shalt.err (!%p3817_p3)
}
0x13d4   : > { %s3821_s17 = scalar_lea.hbm %s4920_s30, 128  ;;  %s3825_s16 = scalar_lea.hbm %s5175_s19, 256 }
0x13d5   : > { %p3822_p2 = scmp.ne.s32.totalorder %s4920_s30, %s3821_s17  ;;  %p3826_p10 = scmp.lt.u32.totalorder %s4920_s30, %s5175_s19 }
0x13d6   : > { %p3827_p13 = scmp.lt.u32.totalorder %s3825_s16, %s3821_s17  ;;  %p3829_p11 = scmp.lt.u32.totalorder %s3821_s17, %s4920_s30 }
0x13d7   : > { %p3823_p6 = pnand %p3822_p2, %p5177_p9 }
0x13d8   : > { %p3828_p8 = por %p3827_p13, %p3826_p10 }
0x13d9   : > { %p3824_p12 = pneg %p3823_p6 }
0x13da   : > { %p3830_p7 = por %p3829_p11, %p3828_p8 }
0x13dc   : > { %p3831_p5 = pnand %p3830_p7, %p3824_p12 }
0x13de   : > { %3834 = shalt.err (!%p3831_p5)
}
0x13df   : > { %3360 = dma.vmem_to_hbm [thread:$0]  (%p5177_p9), %s2695_s29, 128, %s4920_s30, %s2681_s22  }
0x13e0 PF: > { %s5178_s5 = sld [smem:[#allocation34_spill]]  ;;  %s5179_s23 = sld [smem:[#allocation27_spill]] }
0x13e1   : > { %s5180_s12 = sld [smem:[#allocation37_spill]] }
0x13e6   : > { %p3397_p1 = scmp.ge.s32.totalorder %s5178_s5, 2  ;;  %s2706_s1 = sand.u32 1, %s5179_s23  }
0x13e7   : > { %p5181_p4 = scmp.ne.s32.totalorder %s5180_s12, 0  ;;  %s2707_s28 = scalar_lea.sflag [#allocation5], %s2706_s1 }
0x13e9   : > { %p3389_p0 = pnand %p3397_p1, %p5181_p4 }
0x13eb   : > { %3912 = dma.done.wait (!%p3389_p0), %s2707_s28, 128  }
0x13ec   : > { %3914 = vsyncadd (!%p3389_p0), %s2707_s28, 4294967168  ;;  %s42_s6 = sadd.s32 1, %s5178_s5   ;;  %s5182_s3 = sld [smem:[#allocation25_spill]] }
0x13ed   : > { %p39_p3 = scmp.ge.s32.totalorder %s42_s6, 6   ;;  %s5183_s28 = sld [smem:[#allocation26_spill]] }
0x13ee   : > { %s5184_s29 = sld [smem:[#allocation40_spill]]  ;;  %s5185_s30 = sld [smem:[#allocation28_spill]] }
0x13ef   : > { %s5186_s4 = sld [smem:[#allocation29_spill]]  ;;  %s5187_s0 = sld [smem:[#allocation41_spill]] }
0x13f0   : > { %s5188_s23 = sld [smem:[#allocation32_spill]]  ;;  %s5189_s1 = sld [smem:[#allocation33_spill]] }
0x13f1   : > { %s5190_s5 = sld [smem:[#allocation38_spill]]  ;;  %s5191_s24 = sld [smem:[#allocation39_spill]] }
0x13f2   :  { %41 = sbr.rel (!%p39_p3) target bundleno = 36 (0x24), region = 266 }
0x13f9   :  { %2712 = vsyncpa [#allocation4], 1 }
0x13fa   :  { %2714 = vsyncpa [#allocation4 + $0x1], 1 }
0x13fb   :  { %2715 = vsyncpa [#allocation7], 1 }
0x13fc   :  { %2717 = vsyncpa [#allocation7 + $0x1], 1 }
0x13fd   :  { %2718 = vsyncpa [#allocation10], 1 }
0x13fe   :  { %2719 = vsyncpa [#allocation5], 1 }
0x13ff   :  { %2721 = vsyncpa [#allocation5 + $0x1], 1 }

</bundles_post_ra>
